<compile_context>
chip_gen: v5e
topology: v5e:2x2
jax: 0.10.0
libtpu: 0.0.40
codegen_flags: <defaults>
</compile_context>

<pallas_src>
import functools

import jax
import jax.numpy as jnp
from jax.experimental import pallas as pl
from jax.experimental.pallas import tpu as pltpu


# ---------------------------------------------------------------------------
# exact-GELU helper (erf via Abramowitz & Stegun 7.1.26, |abs err| < 1.5e-7).
# Built only from exp/mul/add/where so it lowers cleanly in Mosaic; matches
# PyTorch's default (exact, erf-based) GELU to ~f32 precision.
# ---------------------------------------------------------------------------
def _erf_f32(x):
    a1 = 0.254829592
    a2 = -0.284496736
    a3 = 1.421413741
    a4 = -1.453152027
    a5 = 1.061405429
    p = 0.3275911
    z = jnp.abs(x)
    t = 1.0 / (1.0 + p * z)
    poly = ((((a5 * t + a4) * t + a3) * t + a2) * t + a1) * t
    y = 1.0 - poly * jnp.exp(-z * z)
    return jnp.where(x >= 0.0, y, -y)


def _gelu_exact(x):
    return 0.5 * x * (1.0 + _erf_f32(x * 0.7071067811865476))


# ---------------------------------------------------------------------------
# Fused kernel: for one [tn, E*D] tile of tokens, run all L ExpertGraphConv
# layers (+residual) and the combiner, producing a [tn, D] output tile.
#
#   mb_ref    : SMEM scalar prefetch, shape (L,): message-weight bias per layer.
#   x_ref     : [tn, E*D]  lane-dense activations (expert-major within a row).
#   w_ab_ref  : [L, E*D, 2*E*D] bf16 column-replicated message-weight projection.
#   w_self_ref/ w_neigh_ref : [L, E*D, E*D] bf16 block-diagonal transforms.
#   bias_ref  : [L, E*D] fused (self_bias + neighbor_bias) lane vector.
#   adj_ref   : [L*(E-1), E*D] masked-sigmoid adjacency, rolled lane vectors.
#   cw_ref    : [E*D, D] bf16 combiner weight with the 1/E expert-mean folded in.
#   cb/gamma/beta : combiner bias + LayerNorm params.
# ---------------------------------------------------------------------------
def fused_coupler_kernel(mb_ref, x_ref, w_ab_ref, w_self_ref, w_neigh_ref,
                         bias_ref, adj_ref, cw_ref, cb_ref, gamma_ref, beta_ref,
                         o_ref, *, num_layers, num_experts, embed_dim):
    L, E, D = num_layers, num_experts, embed_dim
    ED = E * D
    x = x_ref[...].astype(jnp.float32)                               # [tn, E*D]

    for l in range(L):                                               # L small & static
        x_bf = x.astype(jnp.bfloat16)                                # MXU operand

        # lane-replicated message projections: one MXU matmul -> [tn, 2*E*D]
        ab = jnp.dot(x_bf, w_ab_ref[l], preferred_element_type=jnp.float32)
        a_rep = ab[:, :ED] + mb_ref[l]                               # a_i + bias, lane-dense
        b_rep = ab[:, ED:]                                           # b_j, lane-dense

        # neighbor messages: (E-1) full-width roll+FMA passes (XLU rolls, VPU FMAs)
        if E > 1:
            msg = None
            for m in range(1, E):                                    # lane group i sees j=(i-m)%E
                gate = jax.nn.sigmoid(a_rep + pltpu.roll(b_rep, m * D, 1))
                row = l * (E - 1) + (m - 1)
                contrib = (gate * adj_ref[row:row + 1, :]) * pltpu.roll(x, m * D, 1)
                msg = contrib if msg is None else msg + contrib
        else:
            msg = jnp.zeros_like(x)

        # block-diagonal self + neighbor transforms (two K=E*D MXU matmuls, no concat)
        upd = (jnp.dot(x_bf, w_self_ref[l], preferred_element_type=jnp.float32)
               + jnp.dot(msg.astype(jnp.bfloat16), w_neigh_ref[l],
                         preferred_element_type=jnp.float32)
               + bias_ref[l:l + 1, :])
        x = _gelu_exact(upd) + x                                     # GELU + residual

    # combiner: (mean over experts folded into the matmul) -> GELU -> LayerNorm
    y = jnp.dot(x.astype(jnp.bfloat16), cw_ref[...],
                preferred_element_type=jnp.float32) + cb_ref[...]
    y = _gelu_exact(y)
    mu = jnp.mean(y, axis=-1, keepdims=True)
    var = jnp.mean((y - mu) ** 2, axis=-1, keepdims=True)            # biased var (torch LN)
    y = (y - mu) * jax.lax.rsqrt(var + 1e-5)
    o_ref[...] = (y * gamma_ref[...] + beta_ref[...]).astype(o_ref.dtype)


# ---------------------------------------------------------------------------
# parameter repacking (PyTorch-shaped params -> fused kernel operands)
# ---------------------------------------------------------------------------
def pack_params(params, num_experts, embed_dim):
    E, D = num_experts, embed_dim
    ED = E * D
    eye = jnp.eye(E, dtype=jnp.float32)
    ones_row = jnp.ones((1, D), jnp.float32)
    w_ab, w_self, w_neigh, bias, adj_rows, mbias = [], [], [], [], [], []
    for p in params["gnn_layers"]:
        w_cur = p["mw_w"][0, :D][:, None]                            # (D,1), target-expert half
        w_oth = p["mw_w"][0, D:][:, None]                            # (D,1), source-expert half
        # column-replicated so the MXU emits lane-dense a_rep / b_rep directly
        w_a = jnp.kron(eye, w_cur * ones_row)                        # (ED, ED)
        w_b = jnp.kron(eye, w_oth * ones_row)                        # (ED, ED)
        w_ab.append(jnp.concatenate([w_a, w_b], axis=1))             # (ED, 2*ED)
        w_self.append(jnp.kron(eye, p["st_wT"]))                     # (ED, ED) block-diag
        w_neigh.append(jnp.kron(eye, p["nt_wT"]))                    # (ED, ED) block-diag
        b_fused = p["st_b"] + p["nt_b"] if E > 1 else p["st_b"]
        bias.append(jnp.tile(b_fused, (1, E))[0])                    # (ED,)
        adj_sig = jax.nn.sigmoid(p["adj_logits"])                    # masked below by m != 0
        for m in range(1, E):
            src = (jnp.arange(E) - m) % E                            # lane group i -> source j
            adj_rows.append(jnp.repeat(adj_sig[jnp.arange(E), src], D))   # (ED,)
        mbias.append(p["mw_b"][0, 0])
    c = params["combiner"]
    cw_mean = jnp.tile(c["cw_T"], (E, 1)) / float(E)                 # mean-over-experts folded in
    adj = jnp.stack(adj_rows) if E > 1 else jnp.zeros((1, ED), jnp.float32)
    return {
        "mbias": jnp.stack(mbias).astype(jnp.float32),               # (L,) -> SMEM
        "w_ab": jnp.stack(w_ab).astype(jnp.bfloat16),                # (L, ED, 2*ED)
        "w_self": jnp.stack(w_self).astype(jnp.bfloat16),            # (L, ED, ED)
        "w_neigh": jnp.stack(w_neigh).astype(jnp.bfloat16),          # (L, ED, ED)
        "bias": jnp.stack(bias).astype(jnp.float32),                 # (L, ED)
        "adj": adj.astype(jnp.float32),                              # (L*(E-1), ED)
        "cw": cw_mean.astype(jnp.bfloat16),                          # (ED, D)
        "cb": c["cb"], "gamma": c["gamma"], "beta": c["beta"],
    }


def _choose_tile(n_tokens, target=1024):
    """Multiple of 8, capped at `target`; prefer >= 2 grid steps and an even
    step count (v7x runs the 'parallel' axis on 2 TensorCores)."""
    if n_tokens <= 8:
        return 8
    tn = min(target, max(8, (-(-n_tokens // 2) // 8) * 8))
    while tn > 8 and (-(-n_tokens // tn)) % 2:
        tn -= 8
    return tn


# ---------------------------------------------------------------------------
# forward wrapper
# ---------------------------------------------------------------------------
def gnn_expert_coupler_forward(expert_outputs, params, tn=None):
    """expert_outputs: list of E arrays [B, S, D] (one per expert)."""
    x = jnp.stack(expert_outputs, axis=2)                            # [B, S, E, D]
    B, S, E, D = x.shape
    L = len(params["gnn_layers"])
    ED = E * D
    N = B * S
    x2d = x.reshape(N, ED)                                           # lane-dense layout

    tn = _choose_tile(N) if tn is None else tn
    n_pad = -(-N // tn) * tn
    if n_pad != N:
        x2d = jnp.pad(x2d, ((0, n_pad - N), (0, 0)))

    packed = pack_params(params, E, D)
    kernel = functools.partial(fused_coupler_kernel,
                               num_layers=L, num_experts=E, embed_dim=D)

    def full_spec(shape):
        return pl.BlockSpec(shape, lambda i, s, _n=len(shape): (0,) * _n)

    out = pl.pallas_call(
        kernel,
        out_shape=jax.ShapeDtypeStruct((n_pad, D), x.dtype),
        grid_spec=pltpu.PrefetchScalarGridSpec(
            num_scalar_prefetch=1,                                   # message biases -> SMEM
            grid=(n_pad // tn,),
            in_specs=[
                pl.BlockSpec((tn, ED), lambda i, s: (i, 0)),         # activations
                full_spec((L, ED, 2 * ED)),                          # w_ab (replicated, bf16)
                full_spec((L, ED, ED)),                              # w_self (bf16)
                full_spec((L, ED, ED)),                              # w_neigh (bf16)
                full_spec((L, ED)),                                  # fused biases
                full_spec(packed["adj"].shape),                      # rolled adjacency lanes
                full_spec((ED, D)),                                  # combiner W (mean folded)
                full_spec((1, D)),                                   # combiner bias
                full_spec((1, D)),                                   # LayerNorm gamma
                full_spec((1, D)),                                   # LayerNorm beta
            ],
            out_specs=pl.BlockSpec((tn, D), lambda i, s: (i, 0)),
        ),
        compiler_params=pltpu.CompilerParams(dimension_semantics=("parallel",)),
    )(packed["mbias"], x2d, packed["w_ab"], packed["w_self"], packed["w_neigh"],
      packed["bias"], packed["adj"], packed["cw"], packed["cb"],
      packed["gamma"], packed["beta"])
    return out[:N].reshape(B, S, D)


# ---------------------------------------------------------------------------
# deterministic parameter init (shapes follow the PyTorch module __init__)
# ---------------------------------------------------------------------------
def init_params(key, embed_dim, num_experts, gnn_layers):
    D, E = embed_dim, num_experts
    layers = []
    scale = 1.0 / jnp.sqrt(D)
    for layer_idx in range(gnn_layers):
        k = jax.random.fold_in(key, layer_idx)
        k1, k2, k3, k4, k5, k6, k7 = jax.random.split(k, 7)
        layers.append({
            "adj_logits": jax.random.normal(k1, (E, E), jnp.float32),
            "mw_w": jax.random.uniform(k2, (1, 2 * D), jnp.float32, -scale, scale),
            "mw_b": jax.random.uniform(k3, (1, 1), jnp.float32, -scale, scale),
            # weights stored pre-transposed (in_dim, out_dim): kernel computes x @ W^T
            "nt_wT": jax.random.uniform(k4, (D, D), jnp.float32, -scale, scale),
            "nt_b": jax.random.uniform(k5, (1, D), jnp.float32, -scale, scale),
            "st_wT": jax.random.uniform(k6, (D, D), jnp.float32, -scale, scale),
            "st_b": jax.random.uniform(k7, (1, D), jnp.float32, -scale, scale),
        })
    kc1, kc2 = jax.random.split(jax.random.fold_in(key, 10_000))
    combiner = {
        "cw_T": jax.random.uniform(kc1, (D, D), jnp.float32, -scale, scale),
        "cb": jax.random.uniform(kc2, (1, D), jnp.float32, -scale, scale),
        "gamma": jnp.ones((1, D), jnp.float32),   # LayerNorm default init
        "beta": jnp.zeros((1, D), jnp.float32),
    }
    return {"gnn_layers": layers, "combiner": combiner}


# ---------------------------------------------------------------------------
# pure-JAX reference (mirrors the PyTorch forward).  `matmul_dtype` selects the
# operand precision of the dense projections (use bf16 to mirror the kernel's
# MXU inputs); accumulation and all pointwise math stay f32.
# ---------------------------------------------------------------------------
def reference_forward(expert_outputs, params, matmul_dtype=jnp.float32):
    cast = lambda t: t.astype(matmul_dtype)
    hp = jax.lax.Precision.HIGHEST
    x = jnp.stack(expert_outputs, axis=2)
    B, S, E, D = x.shape
    feats = x.reshape(B * S, E, D).astype(jnp.float32)
    for p in params["gnn_layers"]:
        adj = jax.nn.sigmoid(p["adj_logits"])
        a = jnp.einsum("ned,d->ne", cast(feats), cast(p["mw_w"][0, :D]),
                       precision=hp, preferred_element_type=jnp.float32) + p["mw_b"][0, 0]
        b = jnp.einsum("ned,d->ne", cast(feats), cast(p["mw_w"][0, D:]),
                       precision=hp, preferred_element_type=jnp.float32)
        content = jax.nn.sigmoid(a[:, :, None] + b[:, None, :])
        mask = 1.0 - jnp.eye(E, dtype=jnp.float32)
        strength = content * (adj * mask)[None]
        msg = jnp.einsum("nij,njd->nid", strength, feats,
                         precision=hp, preferred_element_type=jnp.float32)
        nout = jnp.einsum("ned,dk->nek", cast(msg), cast(p["nt_wT"]),
                          precision=hp, preferred_element_type=jnp.float32) + p["nt_b"]
        sout = jnp.einsum("ned,dk->nek", cast(feats), cast(p["st_wT"]),
                          precision=hp, preferred_element_type=jnp.float32) + p["st_b"]
        feats = jax.nn.gelu(nout + sout, approximate=False) + feats
    c = params["combiner"]
    # mean-over-experts folded into the linear (mathematically identical)
    y = jnp.einsum("ned,dk->nk", cast(feats), cast(c["cw_T"]),
                   precision=hp, preferred_element_type=jnp.float32) / E + c["cb"]
    y = jax.nn.gelu(y, approximate=False)
    mu = y.mean(-1, keepdims=True)
    var = ((y - mu) ** 2).mean(-1, keepdims=True)
    y = (y - mu) / jnp.sqrt(var + 1e-5)
    y = y * c["gamma"] + c["beta"]
    return y.reshape(B, S, D)


if __name__ == "__main__":
    B, S, D, E, L = 2, 8, 32, 4, 2          # batch, seq, embed_dim, num_experts, gnn_layers
    key = jax.random.PRNGKey(0)
    pkey, xkey = jax.random.split(key)
    params = init_params(pkey, D, E, L)
    expert_outputs = [
        jax.random.normal(jax.random.fold_in(xkey, e), (B, S, D), jnp.float32)
        for e in range(E)
    ]

    out = gnn_expert_coupler_forward(expert_outputs, params)
    out = jax.block_until_ready(out)
    assert out.shape == (B, S, D)

    # (1) tight check vs. a reference mirroring the kernel's bf16 MXU-operand precision
    ref_matched = reference_forward(expert_outputs, params, matmul_dtype=jnp.bfloat16)
    err_matched = float(jnp.max(jnp.abs(out - ref_matched)))
    if err_matched > 2e-3:
        raise AssertionError(f"kernel vs bf16-matched reference: max abs err = {err_matched}")

    # (2) loose sanity check vs. the full-f32 reference (bounds bf16 rounding drift)
    ref_f32 = reference_forward(expert_outputs, params, matmul_dtype=jnp.float32)
    err_f32 = float(jnp.max(jnp.abs(out - ref_f32)))
    if err_f32 > 1e-1:
        raise AssertionError(f"kernel vs f32 reference: max abs err = {err_f32}")

    print("KERNEL_OK")
</pallas_src>

<mosaic_0001>
module attributes {stable_mosaic.version = 11 : i64} {
  func.func @fused_coupler_kernel(%arg0: i32, %arg1: memref<2xf32, #tpu.memory_space<smem>>, %arg2: memref<8x128xf32, #tpu.memory_space<vmem>>, %arg3: memref<2x128x256xbf16, #tpu.memory_space<vmem>>, %arg4: memref<2x128x128xbf16, #tpu.memory_space<vmem>>, %arg5: memref<2x128x128xbf16, #tpu.memory_space<vmem>>, %arg6: memref<2x128xf32, #tpu.memory_space<vmem>>, %arg7: memref<6x128xf32, #tpu.memory_space<vmem>>, %arg8: memref<128x32xbf16, #tpu.memory_space<vmem>>, %arg9: memref<1x32xf32, #tpu.memory_space<vmem>>, %arg10: memref<1x32xf32, #tpu.memory_space<vmem>>, %arg11: memref<1x32xf32, #tpu.memory_space<vmem>>, %arg12: memref<8x32xf32, #tpu.memory_space<vmem>>) attributes {dimension_semantics = [#tpu.dimension_semantics<parallel>], iteration_bounds = array<i64: 2>, scalar_prefetch = 1 : i64, scratch_operands = 0 : i64, tpu.core_type = #tpu.core_type<tc>, window_params = [{transform_indices = @transform_0, window_bounds = array<i64: 8, 128>}, {pipeline_mode = #tpu.pipeline_mode<synchronous>, transform_indices = @transform_1, window_bounds = array<i64: 2, 128, 256>}, {pipeline_mode = #tpu.pipeline_mode<synchronous>, transform_indices = @transform_2, window_bounds = array<i64: 2, 128, 128>}, {pipeline_mode = #tpu.pipeline_mode<synchronous>, transform_indices = @transform_3, window_bounds = array<i64: 2, 128, 128>}, {pipeline_mode = #tpu.pipeline_mode<synchronous>, transform_indices = @transform_4, window_bounds = array<i64: 2, 128>}, {pipeline_mode = #tpu.pipeline_mode<synchronous>, transform_indices = @transform_5, window_bounds = array<i64: 6, 128>}, {pipeline_mode = #tpu.pipeline_mode<synchronous>, transform_indices = @transform_6, window_bounds = array<i64: 128, 32>}, {pipeline_mode = #tpu.pipeline_mode<synchronous>, transform_indices = @transform_7, window_bounds = array<i64: 1, 32>}, {pipeline_mode = #tpu.pipeline_mode<synchronous>, transform_indices = @transform_8, window_bounds = array<i64: 1, 32>}, {pipeline_mode = #tpu.pipeline_mode<synchronous>, transform_indices = @transform_9, window_bounds = array<i64: 1, 32>}, {transform_indices = @transform_10, window_bounds = array<i64: 8, 32>}]} {
    %c0 = arith.constant 0 : index
    %c0_0 = arith.constant 0 : index
    %0 = vector.load %arg2[%c0, %c0_0] : memref<8x128xf32, #tpu.memory_space<vmem>>, vector<8x128xf32>
    %1 = arith.truncf %0 : vector<8x128xf32> to vector<8x128xbf16>
    %c0_1 = arith.constant 0 : index
    %c0_2 = arith.constant 0 : index
    %c0_3 = arith.constant 0 : index
    %2 = vector.load %arg3[%c0_1, %c0_2, %c0_3] : memref<2x128x256xbf16, #tpu.memory_space<vmem>>, vector<1x128x256xbf16>
    %3 = vector.shape_cast %2 : vector<1x128x256xbf16> to vector<128x256xbf16>
    %cst = arith.constant dense<0.000000e+00> : vector<8x256xf32>
    %4 = tpu.matmul %1, %3, %cst {dimension_numbers = #tpu.dot_dimension_numbers<[1], [0], [0], [1], [0, 0, 1, 1], [], []>} : vector<8x128xbf16>, vector<128x256xbf16>, vector<8x256xf32> -> vector<8x256xf32>
    %5 = vector.extract_strided_slice %4 {offsets = [0, 0], sizes = [8, 128], strides = [1, 1]} : vector<8x256xf32> to vector<8x128xf32>
    %c0_4 = arith.constant 0 : index
    %6 = memref.load %arg1[%c0_4] : memref<2xf32, #tpu.memory_space<smem>>
    %7 = vector.broadcast %6 : f32 to vector<8x128xf32>
    %8 = arith.addf %5, %7 : vector<8x128xf32>
    %9 = vector.extract_strided_slice %4 {offsets = [0, 128], sizes = [8, 128], strides = [1, 1]} : vector<8x256xf32> to vector<8x128xf32>
    %c32_i32 = arith.constant 32 : i32
    %10 = tpu.dynamic_rotate %9 by %c32_i32 dim 1 : vector<8x128xf32>, i32 -> vector<8x128xf32>
    %11 = arith.addf %8, %10 : vector<8x128xf32>
    %12 = arith.negf %11 : vector<8x128xf32>
    %13 = math.exp %12 : vector<8x128xf32>
    %cst_5 = arith.constant 1.000000e+00 : f32
    %14 = vector.broadcast %cst_5 : f32 to vector<8x128xf32>
    %15 = arith.addf %14, %13 : vector<8x128xf32>
    %16 = arith.divf %14, %15 : vector<8x128xf32>
    %c0_6 = arith.constant 0 : index
    %c0_7 = arith.constant 0 : index
    %17 = vector.load %arg7[%c0_6, %c0_7] : memref<6x128xf32, #tpu.memory_space<vmem>>, vector<1x128xf32>
    %18 = vector.broadcast %17 : vector<1x128xf32> to vector<8x128xf32>
    %19 = arith.mulf %16, %18 : vector<8x128xf32>
    %c32_i32_8 = arith.constant 32 : i32
    %20 = tpu.dynamic_rotate %0 by %c32_i32_8 dim 1 : vector<8x128xf32>, i32 -> vector<8x128xf32>
    %21 = arith.mulf %19, %20 : vector<8x128xf32>
    %c64_i32 = arith.constant 64 : i32
    %22 = tpu.dynamic_rotate %9 by %c64_i32 dim 1 : vector<8x128xf32>, i32 -> vector<8x128xf32>
    %23 = arith.addf %8, %22 : vector<8x128xf32>
    %24 = arith.negf %23 : vector<8x128xf32>
    %25 = math.exp %24 : vector<8x128xf32>
    %cst_9 = arith.constant 1.000000e+00 : f32
    %26 = vector.broadcast %cst_9 : f32 to vector<8x128xf32>
    %27 = arith.addf %26, %25 : vector<8x128xf32>
    %28 = arith.divf %26, %27 : vector<8x128xf32>
    %c1 = arith.constant 1 : index
    %c0_10 = arith.constant 0 : index
    %29 = vector.load %arg7[%c1, %c0_10] : memref<6x128xf32, #tpu.memory_space<vmem>>, vector<1x128xf32>
    %30 = vector.broadcast %29 : vector<1x128xf32> to vector<8x128xf32>
    %31 = arith.mulf %28, %30 : vector<8x128xf32>
    %c64_i32_11 = arith.constant 64 : i32
    %32 = tpu.dynamic_rotate %0 by %c64_i32_11 dim 1 : vector<8x128xf32>, i32 -> vector<8x128xf32>
    %33 = arith.mulf %31, %32 : vector<8x128xf32>
    %34 = arith.addf %21, %33 : vector<8x128xf32>
    %c96_i32 = arith.constant 96 : i32
    %35 = tpu.dynamic_rotate %9 by %c96_i32 dim 1 : vector<8x128xf32>, i32 -> vector<8x128xf32>
    %36 = arith.addf %8, %35 : vector<8x128xf32>
    %37 = arith.negf %36 : vector<8x128xf32>
    %38 = math.exp %37 : vector<8x128xf32>
    %cst_12 = arith.constant 1.000000e+00 : f32
    %39 = vector.broadcast %cst_12 : f32 to vector<8x128xf32>
    %40 = arith.addf %39, %38 : vector<8x128xf32>
    %41 = arith.divf %39, %40 : vector<8x128xf32>
    %c2 = arith.constant 2 : index
    %c0_13 = arith.constant 0 : index
    %42 = vector.load %arg7[%c2, %c0_13] : memref<6x128xf32, #tpu.memory_space<vmem>>, vector<1x128xf32>
    %43 = vector.broadcast %42 : vector<1x128xf32> to vector<8x128xf32>
    %44 = arith.mulf %41, %43 : vector<8x128xf32>
    %c96_i32_14 = arith.constant 96 : i32
    %45 = tpu.dynamic_rotate %0 by %c96_i32_14 dim 1 : vector<8x128xf32>, i32 -> vector<8x128xf32>
    %46 = arith.mulf %44, %45 : vector<8x128xf32>
    %47 = arith.addf %34, %46 : vector<8x128xf32>
    %c0_15 = arith.constant 0 : index
    %c0_16 = arith.constant 0 : index
    %c0_17 = arith.constant 0 : index
    %48 = vector.load %arg4[%c0_15, %c0_16, %c0_17] : memref<2x128x128xbf16, #tpu.memory_space<vmem>>, vector<1x128x128xbf16>
    %49 = vector.shape_cast %48 : vector<1x128x128xbf16> to vector<128x128xbf16>
    %cst_18 = arith.constant dense<0.000000e+00> : vector<8x128xf32>
    %50 = tpu.matmul %1, %49, %cst_18 {dimension_numbers = #tpu.dot_dimension_numbers<[1], [0], [0], [1], [0, 0, 1, 1], [], []>} : vector<8x128xbf16>, vector<128x128xbf16>, vector<8x128xf32> -> vector<8x128xf32>
    %51 = arith.truncf %47 : vector<8x128xf32> to vector<8x128xbf16>
    %c0_19 = arith.constant 0 : index
    %c0_20 = arith.constant 0 : index
    %c0_21 = arith.constant 0 : index
    %52 = vector.load %arg5[%c0_19, %c0_20, %c0_21] : memref<2x128x128xbf16, #tpu.memory_space<vmem>>, vector<1x128x128xbf16>
    %53 = vector.shape_cast %52 : vector<1x128x128xbf16> to vector<128x128xbf16>
    %cst_22 = arith.constant dense<0.000000e+00> : vector<8x128xf32>
    %54 = tpu.matmul %51, %53, %cst_22 {dimension_numbers = #tpu.dot_dimension_numbers<[1], [0], [0], [1], [0, 0, 1, 1], [], []>} : vector<8x128xbf16>, vector<128x128xbf16>, vector<8x128xf32> -> vector<8x128xf32>
    %55 = arith.addf %50, %54 : vector<8x128xf32>
    %c0_23 = arith.constant 0 : index
    %c0_24 = arith.constant 0 : index
    %56 = vector.load %arg6[%c0_23, %c0_24] : memref<2x128xf32, #tpu.memory_space<vmem>>, vector<1x128xf32>
    %57 = vector.broadcast %56 : vector<1x128xf32> to vector<8x128xf32>
    %58 = arith.addf %55, %57 : vector<8x128xf32>
    %cst_25 = arith.constant 5.000000e-01 : f32
    %59 = vector.broadcast %cst_25 : f32 to vector<8x128xf32>
    %60 = arith.mulf %59, %58 : vector<8x128xf32>
    %cst_26 = arith.constant 0.707106769 : f32
    %61 = vector.broadcast %cst_26 : f32 to vector<8x128xf32>
    %62 = arith.mulf %58, %61 : vector<8x128xf32>
    %63 = math.absf %62 : vector<8x128xf32>
    %cst_27 = arith.constant 0.327591091 : f32
    %64 = vector.broadcast %cst_27 : f32 to vector<8x128xf32>
    %65 = arith.mulf %64, %63 : vector<8x128xf32>
    %cst_28 = arith.constant 1.000000e+00 : f32
    %66 = vector.broadcast %cst_28 : f32 to vector<8x128xf32>
    %67 = arith.addf %66, %65 : vector<8x128xf32>
    %cst_29 = arith.constant 1.000000e+00 : f32
    %68 = vector.broadcast %cst_29 : f32 to vector<8x128xf32>
    %69 = arith.divf %68, %67 : vector<8x128xf32>
    %cst_30 = arith.constant 1.06140542 : f32
    %70 = vector.broadcast %cst_30 : f32 to vector<8x128xf32>
    %71 = arith.mulf %70, %69 : vector<8x128xf32>
    %cst_31 = arith.constant -1.45315206 : f32
    %72 = vector.broadcast %cst_31 : f32 to vector<8x128xf32>
    %73 = arith.addf %71, %72 : vector<8x128xf32>
    %74 = arith.mulf %73, %69 : vector<8x128xf32>
    %cst_32 = arith.constant 1.42141378 : f32
    %75 = vector.broadcast %cst_32 : f32 to vector<8x128xf32>
    %76 = arith.addf %74, %75 : vector<8x128xf32>
    %77 = arith.mulf %76, %69 : vector<8x128xf32>
    %cst_33 = arith.constant -0.284496725 : f32
    %78 = vector.broadcast %cst_33 : f32 to vector<8x128xf32>
    %79 = arith.addf %77, %78 : vector<8x128xf32>
    %80 = arith.mulf %79, %69 : vector<8x128xf32>
    %cst_34 = arith.constant 0.254829586 : f32
    %81 = vector.broadcast %cst_34 : f32 to vector<8x128xf32>
    %82 = arith.addf %80, %81 : vector<8x128xf32>
    %83 = arith.mulf %82, %69 : vector<8x128xf32>
    %cst_35 = arith.constant 0.000000e+00 : f32
    %84 = vector.broadcast %cst_35 : f32 to vector<8x128xf32>
    %85 = arith.subf %84, %63 : vector<8x128xf32>
    %86 = arith.mulf %85, %63 : vector<8x128xf32>
    %87 = math.exp %86 : vector<8x128xf32>
    %88 = arith.mulf %83, %87 : vector<8x128xf32>
    %cst_36 = arith.constant 1.000000e+00 : f32
    %89 = vector.broadcast %cst_36 : f32 to vector<8x128xf32>
    %90 = arith.subf %89, %88 : vector<8x128xf32>
    %cst_37 = arith.constant 0.000000e+00 : f32
    %91 = vector.broadcast %cst_37 : f32 to vector<8x128xf32>
    %92 = arith.cmpf oge, %62, %91 : vector<8x128xf32>
    %cst_38 = arith.constant 0.000000e+00 : f32
    %93 = vector.broadcast %cst_38 : f32 to vector<8x128xf32>
    %94 = arith.subf %93, %90 : vector<8x128xf32>
    %95 = arith.select %92, %90, %94 : vector<8x128xi1>, vector<8x128xf32>
    %cst_39 = arith.constant 1.000000e+00 : f32
    %96 = vector.broadcast %cst_39 : f32 to vector<8x128xf32>
    %97 = arith.addf %96, %95 : vector<8x128xf32>
    %98 = arith.mulf %60, %97 : vector<8x128xf32>
    %99 = arith.addf %98, %0 : vector<8x128xf32>
    %100 = arith.truncf %99 : vector<8x128xf32> to vector<8x128xbf16>
    %c1_40 = arith.constant 1 : index
    %c0_41 = arith.constant 0 : index
    %c0_42 = arith.constant 0 : index
    %101 = vector.load %arg3[%c1_40, %c0_41, %c0_42] : memref<2x128x256xbf16, #tpu.memory_space<vmem>>, vector<1x128x256xbf16>
    %102 = vector.shape_cast %101 : vector<1x128x256xbf16> to vector<128x256xbf16>
    %cst_43 = arith.constant dense<0.000000e+00> : vector<8x256xf32>
    %103 = tpu.matmul %100, %102, %cst_43 {dimension_numbers = #tpu.dot_dimension_numbers<[1], [0], [0], [1], [0, 0, 1, 1], [], []>} : vector<8x128xbf16>, vector<128x256xbf16>, vector<8x256xf32> -> vector<8x256xf32>
    %104 = vector.extract_strided_slice %103 {offsets = [0, 0], sizes = [8, 128], strides = [1, 1]} : vector<8x256xf32> to vector<8x128xf32>
    %c1_44 = arith.constant 1 : index
    %105 = memref.load %arg1[%c1_44] : memref<2xf32, #tpu.memory_space<smem>>
    %106 = vector.broadcast %105 : f32 to vector<8x128xf32>
    %107 = arith.addf %104, %106 : vector<8x128xf32>
    %108 = vector.extract_strided_slice %103 {offsets = [0, 128], sizes = [8, 128], strides = [1, 1]} : vector<8x256xf32> to vector<8x128xf32>
    %c32_i32_45 = arith.constant 32 : i32
    %109 = tpu.dynamic_rotate %108 by %c32_i32_45 dim 1 : vector<8x128xf32>, i32 -> vector<8x128xf32>
    %110 = arith.addf %107, %109 : vector<8x128xf32>
    %111 = arith.negf %110 : vector<8x128xf32>
    %112 = math.exp %111 : vector<8x128xf32>
    %cst_46 = arith.constant 1.000000e+00 : f32
    %113 = vector.broadcast %cst_46 : f32 to vector<8x128xf32>
    %114 = arith.addf %113, %112 : vector<8x128xf32>
    %115 = arith.divf %113, %114 : vector<8x128xf32>
    %c3 = arith.constant 3 : index
    %c0_47 = arith.constant 0 : index
    %116 = vector.load %arg7[%c3, %c0_47] : memref<6x128xf32, #tpu.memory_space<vmem>>, vector<1x128xf32>
    %117 = vector.broadcast %116 : vector<1x128xf32> to vector<8x128xf32>
    %118 = arith.mulf %115, %117 : vector<8x128xf32>
    %c32_i32_48 = arith.constant 32 : i32
    %119 = tpu.dynamic_rotate %99 by %c32_i32_48 dim 1 : vector<8x128xf32>, i32 -> vector<8x128xf32>
    %120 = arith.mulf %118, %119 : vector<8x128xf32>
    %c64_i32_49 = arith.constant 64 : i32
    %121 = tpu.dynamic_rotate %108 by %c64_i32_49 dim 1 : vector<8x128xf32>, i32 -> vector<8x128xf32>
    %122 = arith.addf %107, %121 : vector<8x128xf32>
    %123 = arith.negf %122 : vector<8x128xf32>
    %124 = math.exp %123 : vector<8x128xf32>
    %cst_50 = arith.constant 1.000000e+00 : f32
    %125 = vector.broadcast %cst_50 : f32 to vector<8x128xf32>
    %126 = arith.addf %125, %124 : vector<8x128xf32>
    %127 = arith.divf %125, %126 : vector<8x128xf32>
    %c4 = arith.constant 4 : index
    %c0_51 = arith.constant 0 : index
    %128 = vector.load %arg7[%c4, %c0_51] : memref<6x128xf32, #tpu.memory_space<vmem>>, vector<1x128xf32>
    %129 = vector.broadcast %128 : vector<1x128xf32> to vector<8x128xf32>
    %130 = arith.mulf %127, %129 : vector<8x128xf32>
    %c64_i32_52 = arith.constant 64 : i32
    %131 = tpu.dynamic_rotate %99 by %c64_i32_52 dim 1 : vector<8x128xf32>, i32 -> vector<8x128xf32>
    %132 = arith.mulf %130, %131 : vector<8x128xf32>
    %133 = arith.addf %120, %132 : vector<8x128xf32>
    %c96_i32_53 = arith.constant 96 : i32
    %134 = tpu.dynamic_rotate %108 by %c96_i32_53 dim 1 : vector<8x128xf32>, i32 -> vector<8x128xf32>
    %135 = arith.addf %107, %134 : vector<8x128xf32>
    %136 = arith.negf %135 : vector<8x128xf32>
    %137 = math.exp %136 : vector<8x128xf32>
    %cst_54 = arith.constant 1.000000e+00 : f32
    %138 = vector.broadcast %cst_54 : f32 to vector<8x128xf32>
    %139 = arith.addf %138, %137 : vector<8x128xf32>
    %140 = arith.divf %138, %139 : vector<8x128xf32>
    %c5 = arith.constant 5 : index
    %c0_55 = arith.constant 0 : index
    %141 = vector.load %arg7[%c5, %c0_55] : memref<6x128xf32, #tpu.memory_space<vmem>>, vector<1x128xf32>
    %142 = vector.broadcast %141 : vector<1x128xf32> to vector<8x128xf32>
    %143 = arith.mulf %140, %142 : vector<8x128xf32>
    %c96_i32_56 = arith.constant 96 : i32
    %144 = tpu.dynamic_rotate %99 by %c96_i32_56 dim 1 : vector<8x128xf32>, i32 -> vector<8x128xf32>
    %145 = arith.mulf %143, %144 : vector<8x128xf32>
    %146 = arith.addf %133, %145 : vector<8x128xf32>
    %c1_57 = arith.constant 1 : index
    %c0_58 = arith.constant 0 : index
    %c0_59 = arith.constant 0 : index
    %147 = vector.load %arg4[%c1_57, %c0_58, %c0_59] : memref<2x128x128xbf16, #tpu.memory_space<vmem>>, vector<1x128x128xbf16>
    %148 = vector.shape_cast %147 : vector<1x128x128xbf16> to vector<128x128xbf16>
    %cst_60 = arith.constant dense<0.000000e+00> : vector<8x128xf32>
    %149 = tpu.matmul %100, %148, %cst_60 {dimension_numbers = #tpu.dot_dimension_numbers<[1], [0], [0], [1], [0, 0, 1, 1], [], []>} : vector<8x128xbf16>, vector<128x128xbf16>, vector<8x128xf32> -> vector<8x128xf32>
    %150 = arith.truncf %146 : vector<8x128xf32> to vector<8x128xbf16>
    %c1_61 = arith.constant 1 : index
    %c0_62 = arith.constant 0 : index
    %c0_63 = arith.constant 0 : index
    %151 = vector.load %arg5[%c1_61, %c0_62, %c0_63] : memref<2x128x128xbf16, #tpu.memory_space<vmem>>, vector<1x128x128xbf16>
    %152 = vector.shape_cast %151 : vector<1x128x128xbf16> to vector<128x128xbf16>
    %cst_64 = arith.constant dense<0.000000e+00> : vector<8x128xf32>
    %153 = tpu.matmul %150, %152, %cst_64 {dimension_numbers = #tpu.dot_dimension_numbers<[1], [0], [0], [1], [0, 0, 1, 1], [], []>} : vector<8x128xbf16>, vector<128x128xbf16>, vector<8x128xf32> -> vector<8x128xf32>
    %154 = arith.addf %149, %153 : vector<8x128xf32>
    %c1_65 = arith.constant 1 : index
    %c0_66 = arith.constant 0 : index
    %155 = vector.load %arg6[%c1_65, %c0_66] : memref<2x128xf32, #tpu.memory_space<vmem>>, vector<1x128xf32>
    %156 = vector.broadcast %155 : vector<1x128xf32> to vector<8x128xf32>
    %157 = arith.addf %154, %156 : vector<8x128xf32>
    %cst_67 = arith.constant 5.000000e-01 : f32
    %158 = vector.broadcast %cst_67 : f32 to vector<8x128xf32>
    %159 = arith.mulf %158, %157 : vector<8x128xf32>
    %cst_68 = arith.constant 0.707106769 : f32
    %160 = vector.broadcast %cst_68 : f32 to vector<8x128xf32>
    %161 = arith.mulf %157, %160 : vector<8x128xf32>
    %162 = math.absf %161 : vector<8x128xf32>
    %cst_69 = arith.constant 0.327591091 : f32
    %163 = vector.broadcast %cst_69 : f32 to vector<8x128xf32>
    %164 = arith.mulf %163, %162 : vector<8x128xf32>
    %cst_70 = arith.constant 1.000000e+00 : f32
    %165 = vector.broadcast %cst_70 : f32 to vector<8x128xf32>
    %166 = arith.addf %165, %164 : vector<8x128xf32>
    %cst_71 = arith.constant 1.000000e+00 : f32
    %167 = vector.broadcast %cst_71 : f32 to vector<8x128xf32>
    %168 = arith.divf %167, %166 : vector<8x128xf32>
    %cst_72 = arith.constant 1.06140542 : f32
    %169 = vector.broadcast %cst_72 : f32 to vector<8x128xf32>
    %170 = arith.mulf %169, %168 : vector<8x128xf32>
    %cst_73 = arith.constant -1.45315206 : f32
    %171 = vector.broadcast %cst_73 : f32 to vector<8x128xf32>
    %172 = arith.addf %170, %171 : vector<8x128xf32>
    %173 = arith.mulf %172, %168 : vector<8x128xf32>
    %cst_74 = arith.constant 1.42141378 : f32
    %174 = vector.broadcast %cst_74 : f32 to vector<8x128xf32>
    %175 = arith.addf %173, %174 : vector<8x128xf32>
    %176 = arith.mulf %175, %168 : vector<8x128xf32>
    %cst_75 = arith.constant -0.284496725 : f32
    %177 = vector.broadcast %cst_75 : f32 to vector<8x128xf32>
    %178 = arith.addf %176, %177 : vector<8x128xf32>
    %179 = arith.mulf %178, %168 : vector<8x128xf32>
    %cst_76 = arith.constant 0.254829586 : f32
    %180 = vector.broadcast %cst_76 : f32 to vector<8x128xf32>
    %181 = arith.addf %179, %180 : vector<8x128xf32>
    %182 = arith.mulf %181, %168 : vector<8x128xf32>
    %cst_77 = arith.constant 0.000000e+00 : f32
    %183 = vector.broadcast %cst_77 : f32 to vector<8x128xf32>
    %184 = arith.subf %183, %162 : vector<8x128xf32>
    %185 = arith.mulf %184, %162 : vector<8x128xf32>
    %186 = math.exp %185 : vector<8x128xf32>
    %187 = arith.mulf %182, %186 : vector<8x128xf32>
    %cst_78 = arith.constant 1.000000e+00 : f32
    %188 = vector.broadcast %cst_78 : f32 to vector<8x128xf32>
    %189 = arith.subf %188, %187 : vector<8x128xf32>
    %cst_79 = arith.constant 0.000000e+00 : f32
    %190 = vector.broadcast %cst_79 : f32 to vector<8x128xf32>
    %191 = arith.cmpf oge, %161, %190 : vector<8x128xf32>
    %cst_80 = arith.constant 0.000000e+00 : f32
    %192 = vector.broadcast %cst_80 : f32 to vector<8x128xf32>
    %193 = arith.subf %192, %189 : vector<8x128xf32>
    %194 = arith.select %191, %189, %193 : vector<8x128xi1>, vector<8x128xf32>
    %cst_81 = arith.constant 1.000000e+00 : f32
    %195 = vector.broadcast %cst_81 : f32 to vector<8x128xf32>
    %196 = arith.addf %195, %194 : vector<8x128xf32>
    %197 = arith.mulf %159, %196 : vector<8x128xf32>
    %198 = arith.addf %197, %99 : vector<8x128xf32>
    %199 = arith.truncf %198 : vector<8x128xf32> to vector<8x128xbf16>
    %c0_82 = arith.constant 0 : index
    %c0_83 = arith.constant 0 : index
    %200 = vector.load %arg8[%c0_82, %c0_83] : memref<128x32xbf16, #tpu.memory_space<vmem>>, vector<128x32xbf16>
    %cst_84 = arith.constant dense<0.000000e+00> : vector<8x32xf32>
    %201 = tpu.matmul %199, %200, %cst_84 {dimension_numbers = #tpu.dot_dimension_numbers<[1], [0], [0], [1], [0, 0, 1, 1], [], []>} : vector<8x128xbf16>, vector<128x32xbf16>, vector<8x32xf32> -> vector<8x32xf32>
    %c0_85 = arith.constant 0 : index
    %c0_86 = arith.constant 0 : index
    %202 = vector.load %arg9[%c0_85, %c0_86] : memref<1x32xf32, #tpu.memory_space<vmem>>, vector<1x32xf32>
    %203 = vector.broadcast %202 : vector<1x32xf32> to vector<8x32xf32>
    %204 = arith.addf %201, %203 : vector<8x32xf32>
    %cst_87 = arith.constant 5.000000e-01 : f32
    %205 = vector.broadcast %cst_87 : f32 to vector<8x32xf32>
    %206 = arith.mulf %205, %204 : vector<8x32xf32>
    %cst_88 = arith.constant 0.707106769 : f32
    %207 = vector.broadcast %cst_88 : f32 to vector<8x32xf32>
    %208 = arith.mulf %204, %207 : vector<8x32xf32>
    %209 = math.absf %208 : vector<8x32xf32>
    %cst_89 = arith.constant 0.327591091 : f32
    %210 = vector.broadcast %cst_89 : f32 to vector<8x32xf32>
    %211 = arith.mulf %210, %209 : vector<8x32xf32>
    %cst_90 = arith.constant 1.000000e+00 : f32
    %212 = vector.broadcast %cst_90 : f32 to vector<8x32xf32>
    %213 = arith.addf %212, %211 : vector<8x32xf32>
    %cst_91 = arith.constant 1.000000e+00 : f32
    %214 = vector.broadcast %cst_91 : f32 to vector<8x32xf32>
    %215 = arith.divf %214, %213 : vector<8x32xf32>
    %cst_92 = arith.constant 1.06140542 : f32
    %216 = vector.broadcast %cst_92 : f32 to vector<8x32xf32>
    %217 = arith.mulf %216, %215 : vector<8x32xf32>
    %cst_93 = arith.constant -1.45315206 : f32
    %218 = vector.broadcast %cst_93 : f32 to vector<8x32xf32>
    %219 = arith.addf %217, %218 : vector<8x32xf32>
    %220 = arith.mulf %219, %215 : vector<8x32xf32>
    %cst_94 = arith.constant 1.42141378 : f32
    %221 = vector.broadcast %cst_94 : f32 to vector<8x32xf32>
    %222 = arith.addf %220, %221 : vector<8x32xf32>
    %223 = arith.mulf %222, %215 : vector<8x32xf32>
    %cst_95 = arith.constant -0.284496725 : f32
    %224 = vector.broadcast %cst_95 : f32 to vector<8x32xf32>
    %225 = arith.addf %223, %224 : vector<8x32xf32>
    %226 = arith.mulf %225, %215 : vector<8x32xf32>
    %cst_96 = arith.constant 0.254829586 : f32
    %227 = vector.broadcast %cst_96 : f32 to vector<8x32xf32>
    %228 = arith.addf %226, %227 : vector<8x32xf32>
    %229 = arith.mulf %228, %215 : vector<8x32xf32>
    %cst_97 = arith.constant 0.000000e+00 : f32
    %230 = vector.broadcast %cst_97 : f32 to vector<8x32xf32>
    %231 = arith.subf %230, %209 : vector<8x32xf32>
    %232 = arith.mulf %231, %209 : vector<8x32xf32>
    %233 = math.exp %232 : vector<8x32xf32>
    %234 = arith.mulf %229, %233 : vector<8x32xf32>
    %cst_98 = arith.constant 1.000000e+00 : f32
    %235 = vector.broadcast %cst_98 : f32 to vector<8x32xf32>
    %236 = arith.subf %235, %234 : vector<8x32xf32>
    %cst_99 = arith.constant 0.000000e+00 : f32
    %237 = vector.broadcast %cst_99 : f32 to vector<8x32xf32>
    %238 = arith.cmpf oge, %208, %237 : vector<8x32xf32>
    %cst_100 = arith.constant 0.000000e+00 : f32
    %239 = vector.broadcast %cst_100 : f32 to vector<8x32xf32>
    %240 = arith.subf %239, %236 : vector<8x32xf32>
    %241 = arith.select %238, %236, %240 : vector<8x32xi1>, vector<8x32xf32>
    %cst_101 = arith.constant 1.000000e+00 : f32
    %242 = vector.broadcast %cst_101 : f32 to vector<8x32xf32>
    %243 = arith.addf %242, %241 : vector<8x32xf32>
    %244 = arith.mulf %206, %243 : vector<8x32xf32>
    %cst_102 = arith.constant dense<0.000000e+00> : vector<8xf32>
    %245 = vector.multi_reduction <add>, %244, %cst_102 [1] : vector<8x32xf32> to vector<8xf32>
    %246 = vector.shape_cast %245 : vector<8xf32> to vector<8x1xf32>
    %cst_103 = arith.constant 3.200000e+01 : f32
    %247 = vector.broadcast %cst_103 : f32 to vector<8x1xf32>
    %248 = arith.divf %246, %247 : vector<8x1xf32>
    %249 = vector.broadcast %248 : vector<8x1xf32> to vector<8x32xf32>
    %250 = arith.subf %244, %249 : vector<8x32xf32>
    %251 = arith.mulf %250, %250 : vector<8x32xf32>
    %cst_104 = arith.constant dense<0.000000e+00> : vector<8xf32>
    %252 = vector.multi_reduction <add>, %251, %cst_104 [1] : vector<8x32xf32> to vector<8xf32>
    %253 = vector.shape_cast %252 : vector<8xf32> to vector<8x1xf32>
    %cst_105 = arith.constant 3.200000e+01 : f32
    %254 = vector.broadcast %cst_105 : f32 to vector<8x1xf32>
    %255 = arith.divf %253, %254 : vector<8x1xf32>
    %256 = vector.broadcast %248 : vector<8x1xf32> to vector<8x32xf32>
    %257 = arith.subf %244, %256 : vector<8x32xf32>
    %cst_106 = arith.constant 9.99999974E-6 : f32
    %258 = vector.broadcast %cst_106 : f32 to vector<8x1xf32>
    %259 = arith.addf %255, %258 : vector<8x1xf32>
    %260 = math.rsqrt %259 : vector<8x1xf32>
    %261 = vector.broadcast %260 : vector<8x1xf32> to vector<8x32xf32>
    %262 = arith.mulf %257, %261 : vector<8x32xf32>
    %c0_107 = arith.constant 0 : index
    %c0_108 = arith.constant 0 : index
    %263 = vector.load %arg10[%c0_107, %c0_108] : memref<1x32xf32, #tpu.memory_space<vmem>>, vector<1x32xf32>
    %264 = vector.broadcast %263 : vector<1x32xf32> to vector<8x32xf32>
    %265 = arith.mulf %262, %264 : vector<8x32xf32>
    %c0_109 = arith.constant 0 : index
    %c0_110 = arith.constant 0 : index
    %266 = vector.load %arg11[%c0_109, %c0_110] : memref<1x32xf32, #tpu.memory_space<vmem>>, vector<1x32xf32>
    %267 = vector.broadcast %266 : vector<1x32xf32> to vector<8x32xf32>
    %268 = arith.addf %265, %267 : vector<8x32xf32>
    %c0_111 = arith.constant 0 : index
    %c0_112 = arith.constant 0 : index
    %269 = vector.load %arg12[%c0_111, %c0_112] : memref<8x32xf32, #tpu.memory_space<vmem>>, vector<8x32xf32>
    tpu.vector_store %arg12[%c0_111, %c0_112], %268 {strides = array<i32>} : memref<8x32xf32, #tpu.memory_space<vmem>>, vector<8x32xf32>,
    return
  }
  func.func @transform_0(%arg0: i32, %arg1: memref<2xf32, #tpu.memory_space<smem>>) -> (i32, i32) {
    %c0_i32 = arith.constant 0 : i32
    %c0_i32_0 = arith.constant 0 : i32
    return %arg0, %c0_i32 : i32, i32
  }
  func.func @transform_1(%arg0: i32, %arg1: memref<2xf32, #tpu.memory_space<smem>>) -> (i32, i32, i32) {
    %c0_i32 = arith.constant 0 : i32
    %c0_i32_0 = arith.constant 0 : i32
    %c0_i32_1 = arith.constant 0 : i32
    %c0_i32_2 = arith.constant 0 : i32
    return %c0_i32, %c0_i32_0, %c0_i32_1 : i32, i32, i32
  }
  func.func @transform_2(%arg0: i32, %arg1: memref<2xf32, #tpu.memory_space<smem>>) -> (i32, i32, i32) {
    %c0_i32 = arith.constant 0 : i32
    %c0_i32_0 = arith.constant 0 : i32
    %c0_i32_1 = arith.constant 0 : i32
    %c0_i32_2 = arith.constant 0 : i32
    return %c0_i32, %c0_i32_0, %c0_i32_1 : i32, i32, i32
  }
  func.func @transform_3(%arg0: i32, %arg1: memref<2xf32, #tpu.memory_space<smem>>) -> (i32, i32, i32) {
    %c0_i32 = arith.constant 0 : i32
    %c0_i32_0 = arith.constant 0 : i32
    %c0_i32_1 = arith.constant 0 : i32
    %c0_i32_2 = arith.constant 0 : i32
    return %c0_i32, %c0_i32_0, %c0_i32_1 : i32, i32, i32
  }
  func.func @transform_4(%arg0: i32, %arg1: memref<2xf32, #tpu.memory_space<smem>>) -> (i32, i32) {
    %c0_i32 = arith.constant 0 : i32
    %c0_i32_0 = arith.constant 0 : i32
    %c0_i32_1 = arith.constant 0 : i32
    return %c0_i32, %c0_i32_0 : i32, i32
  }
  func.func @transform_5(%arg0: i32, %arg1: memref<2xf32, #tpu.memory_space<smem>>) -> (i32, i32) {
    %c0_i32 = arith.constant 0 : i32
    %c0_i32_0 = arith.constant 0 : i32
    %c0_i32_1 = arith.constant 0 : i32
    return %c0_i32, %c0_i32_0 : i32, i32
  }
  func.func @transform_6(%arg0: i32, %arg1: memref<2xf32, #tpu.memory_space<smem>>) -> (i32, i32) {
    %c0_i32 = arith.constant 0 : i32
    %c0_i32_0 = arith.constant 0 : i32
    %c0_i32_1 = arith.constant 0 : i32
    return %c0_i32, %c0_i32_0 : i32, i32
  }
  func.func @transform_7(%arg0: i32, %arg1: memref<2xf32, #tpu.memory_space<smem>>) -> (i32, i32) {
    %c0_i32 = arith.constant 0 : i32
    %c0_i32_0 = arith.constant 0 : i32
    %c0_i32_1 = arith.constant 0 : i32
    return %c0_i32, %c0_i32_0 : i32, i32
  }
  func.func @transform_8(%arg0: i32, %arg1: memref<2xf32, #tpu.memory_space<smem>>) -> (i32, i32) {
    %c0_i32 = arith.constant 0 : i32
    %c0_i32_0 = arith.constant 0 : i32
    %c0_i32_1 = arith.constant 0 : i32
    return %c0_i32, %c0_i32_0 : i32, i32
  }
  func.func @transform_9(%arg0: i32, %arg1: memref<2xf32, #tpu.memory_space<smem>>) -> (i32, i32) {
    %c0_i32 = arith.constant 0 : i32
    %c0_i32_0 = arith.constant 0 : i32
    %c0_i32_1 = arith.constant 0 : i32
    return %c0_i32, %c0_i32_0 : i32, i32
  }
  func.func @transform_10(%arg0: i32, %arg1: memref<2xf32, #tpu.memory_space<smem>>) -> (i32, i32) {
    %c0_i32 = arith.constant 0 : i32
    %c0_i32_0 = arith.constant 0 : i32
    return %arg0, %c0_i32 : i32, i32
  }
}

</mosaic_0001>

<bundles_post_ra>
// kernel: tpu_custom_call.1
= control target key start
LH: loop header
LB: loop body
LE: loop exit
PB: predicated region body
PF: predicated region fallthrough
CT: control target
= control target key end

     0   :  { %s2198_s20 = smov [#allocation3]   ;;  %s2527_s0 = inlined_call_operand.vmem [shape: f32[2], index: 0, kind: input, shape index: {}]   ;;  %s2528_s1 = inlined_call_operand.vmem [shape: f32[16,128], index: 1, kind: input, shape index: {}]   ;;  %s2529_s2 = inlined_call_operand.hbm [shape: bf16[2,128,256], index: 2, kind: input, shape index: {}]   ;;  %s2530_s3 = inlined_call_operand.hbm [shape: bf16[2,128,128], index: 3, kind: input, shape index: {}]   ;;  %s2531_s4 = inlined_call_operand.hbm [shape: bf16[2,128,128], index: 4, kind: input, shape index: {}]   ;;  %s2532_s5 = inlined_call_operand.vmem [shape: f32[2,128], index: 5, kind: input, shape index: {}]   ;;  %s2533_s6 = inlined_call_operand.vmem [shape: f32[6,128], index: 6, kind: input, shape index: {}]   ;;  %s2534_s7 = inlined_call_operand.vmem [shape: bf16[128,32], index: 7, kind: input, shape index: {}]   ;;  %s2535_s8 = inlined_call_operand.vmem [shape: f32[1,32], index: 8, kind: input, shape index: {}]   ;;  %s2536_s9 = inlined_call_operand.vmem [shape: f32[1,32], index: 9, kind: input, shape index: {}]   ;;  %s2537_s10 = inlined_call_operand.vmem [shape: f32[1,32], index: 10, kind: input, shape index: {}]   ;;  %s2538_s11 = inlined_call_operand.hbm [shape: f32[16,32], index: 11, kind: output, shape index: {}]  }
   0x1   :  { %2542 = sst [smem:[#allocation18_spill]] %s2529_s2  ;;  %s17_s19 = sshll.u32 %s2527_s0, 4  ;;  %s18_s19 = int_to_ptr.vmem [resolvable:$true] %s17_s19 }
   0x2   :  { %2543 = sst [smem:[#allocation19_spill]] %s2530_s3 }
   0x3   :  { %20 = dma.vmem_to_smem %s18_s19, 16, %s2198_s20, [#allocation2] }
   0x4   :  { %2168 = dma.done.wait [#allocation2], 16 }
   0x5   :  { %2169 = vsyncadd [#allocation2], 4294967280 }
   0x6   :  { %23 = sfence }
   0x7   :  { %24 = vsyncpa [#allocation5], 0 }
   0x8   :  { %25 = vsyncpa [#allocation8], 0 }
   0x9   :  { %26 = vsyncpa [#allocation6], 0 }
   0xa   :  { %28 = vsyncpa [#allocation6 + $0x1], 0  ;;  %s2273_s21 = smov 0   ;;  %s2275_s22 = smov 0  }
   0xb   :  { %s2277_s23 = smov 0   ;;  %s2279_s24 = smov 0  }
   0xc LB: > { %2544 = sst [smem:[#allocation15_spill]] %s2192_s23  ;;  %s2294_s0 = sadd.s32 4294967295, %s2196_s24   ;;  %s2196_s24 = sphi %s2279_s24, %s2559_s24   ;;  %s2192_s23 = sphi %s2277_s23, %s2564_s23   ;;  %s2188_s22 = sphi %s2275_s22, %s2563_s22   ;;  %s2184_s21 = sphi %s2273_s21, %s2562_s21  }
   0xd   : > { %s1509_s25 = sadd.s32 4294967294, %s2196_s24   ;;  %s2298_s26 = sadd.s32 1, %s2196_s24  }
   0xe   : > { %2545 = sst [smem:[#allocation16_spill]] %s2298_s26  ;;  %s256_s27 = sadd.s32 1, %s2192_s23 }
   0xf   : > { %s253_s28 = ssub.s32 %s2196_s24, %s2298_s26  ;;  %p266_p0 = scmp.ne.s32.totalorder %s2192_s23, %s2188_s22 }
  0x10   : > { %p254_p1 = scmp.eq.s32.totalorder %s253_s28, 0  ;;  %p267_p2 = scmp.eq.s32.totalorder %s2294_s0, 1 }
  0x11   : > { %p272_p3 = scmp.ne.s32.totalorder %s2188_s22, %s2184_s21  ;;  %p273_p4 = scmp.eq.s32.totalorder %s1509_s25, 1 }
  0x12   : > { %s2309_s29 = scalar_select %p254_p1, %s2192_s23, %s256_s27  }
  0x13   : > { %p2311_p5 = por %p267_p2, %p266_p0  ;;  %p2315_p6 = por %p273_p4, %p272_p3 }
  0x14   : > { %2546 = sst [smem:[#allocation17_spill]] %s2309_s29  ;;  %p1510_p7 = scmp.ge.s32.totalorder %s2196_s24, 1 }
  0x15   : > { %p280_p8 = scmp.lt.s32.totalorder %s2196_s24, 3  ;;  %p1920_p9 = scmp.eq.s32.totalorder %s2294_s0, 0 }
  0x16   : > { %s2550_s3 = sld [smem:[#allocation19_spill]]  ;;  %s2199_s17 = smov [#allocation7]  }
  0x17   : > { %p2322_p10 = pnand %p1510_p7, %p280_p8  ;;  %s307_s18 = sshll.u32 %s2199_s17, 4  ;;  %s308_s18 = int_to_ptr.vmem [resolvable:$true] %s307_s18 }
  0x18   : > { %s2552_s2 = sld [smem:[#allocation18_spill]]  ;;  %s2200_s28 = smov 64  }
  0x19   : > { %p1906_p11 = pneg %p2322_p10  ;;  %s2201_s14 = smov 4  }
  0x1a   : > { %s2202_s15 = smov [#allocation4]   ;;  %s2204_s29 = smov 8  }
  0x1b   : > { %p2333_p12 = pnand %p1920_p9, %p1906_p11  ;;  %s293_s17 = sshll.u32 %s2202_s15, 4  ;;  %s294_s17 = int_to_ptr.vmem [resolvable:$true] %s293_s17 }
  0x1c   : > { %s305_s16 = sshll.u32 %s2550_s3, 4  ;;  %s2203_s3 = smov 128   ;;  %s306_s16 = int_to_ptr.hbm [resolvable:$true] %s305_s16 }
  0x1d   : > { %1912 = dma.hbm_to_vmem [thread:$0]  (!%p2333_p12), %s306_s16, 2048, %s308_s18, [#allocation8], %s2200_s28, %s2200_s28, %s2201_s14  }
  0x1e   : > { %s291_s27 = sshll.u32 %s2552_s2, 4  ;;  %s319_s20 = sshll.u32 %s2531_s4, 4  ;;  %s292_s27 = int_to_ptr.hbm [resolvable:$true] %s291_s27  ;;  %s320_s20 = int_to_ptr.hbm [resolvable:$true] %s319_s20 }
  0x1f   : > { %1909 = dma.hbm_to_vmem [thread:$0]  (!%p2333_p12), %s292_s27, 4096, %s294_s17, [#allocation5], %s2203_s3, %s2203_s3, %s2204_s29  }
  0x20   : > { %s2205_s25 = smov [#allocation9]   ;;  %362 = sbr.rel (%p2322_p10) target bundleno = 1486 (0x5ce), region = 60 }
  0x21   : > { %s321_s2 = sshll.u32 %s2205_s25, 4  ;;  %s322_s2 = int_to_ptr.vmem [resolvable:$true] %s321_s2 }
  0x22   : > { %1915 = dma.hbm_to_vmem [thread:$0]  (!%p2333_p12), %s320_s20, 2048, %s322_s2, [#allocation8], %s2200_s28, %s2200_s28, %s2201_s14  }
  0x25   : > { %2171 = dma.done.wait (%p1920_p9), [#allocation5], 4096  }
  0x26   : > { %2173 = vsyncadd (%p1920_p9), [#allocation5], 4294963200 }
  0x27   : > { %2175 = dma.done.wait (%p1920_p9), [#allocation8], 4096  }
  0x28   : > { %2177 = vsyncadd (%p1920_p9), [#allocation8], 4294963200  ;;  %v1834_v0 = vld [vmem:[#allocation4 + $0x74] sm:$0xf]  ;;  %v1581_v1 = vld [vmem:[#allocation4 + $0x78] sm:$0xf0] }
  0x29   : > { %v1832_v2 = vld [vmem:[#allocation4 + $0x64] sm:$0xf]  ;;  %v1584_v3 = vor.u32 %v1834_v0, %v1581_v1  ;;  %v1573_v4 = vld [vmem:[#allocation4 + $0x68] sm:$0xf0]  ;;  %v1830_v6 = vld [vmem:[#allocation4 + $0x54] sm:$0xf] }
  0x2a   : > { %v1576_v5 = vor.u32 %v1832_v2, %v1573_v4  ;;  %v1565_v7 = vld [vmem:[#allocation4 + $0x58] sm:$0xf0]  ;;  %v1579_v8 = vld [vmem:[#allocation4 + $0x70] sm:$0xf]  ;;  %v1835_v9 = vld [vmem:[#allocation4 + $0x74] sm:$0xf0] }
  0x2b   : > { %525 = vmatpush.bf16.msra.mxu1 %v1584_v3  ;;  %v1571_v10 = vld [vmem:[#allocation4 + $0x60] sm:$0xf]  ;;  %v1833_v11 = vld [vmem:[#allocation4 + $0x64] sm:$0xf0]  ;;  %v1568_v12 = vor.u32 %v1830_v6, %v1565_v7  ;;  %v1580_v13 = vor.u32 %v1835_v9, %v1579_v8  ;;  %v1828_v14 = vld [vmem:[#allocation4 + $0x44] sm:$0xf] }
  0x2c   : > { %v1557_v15 = vld [vmem:[#allocation4 + $0x48] sm:$0xf0]  ;;  %p410_p13 = scmp.lt.s32.totalorder %s2294_s0, 1  ;;  %v1572_v16 = vor.u32 %v1833_v11, %v1571_v10  ;;  %v1826_v17 = vld [vmem:[#allocation4 + $0x34] sm:$0xf]  ;;  %s2206_s13 = smov 64  }
  0x2d   : > { %512 = vmatpush.bf16.msra.mxu0 %v1580_v13  ;;  %v1549_v18 = vld [vmem:[#allocation4 + $0x38] sm:$0xf0]  ;;  %v1563_v19 = vld [vmem:[#allocation4 + $0x50] sm:$0xf]  ;;  %v1831_v20 = vld [vmem:[#allocation4 + $0x54] sm:$0xf0]  ;;  %v1560_v21 = vor.u32 %v1828_v14, %v1557_v15 }
  0x2e   : > { %v1555_v22 = vld [vmem:[#allocation4 + $0x40] sm:$0xf]  ;;  %v1564_v23 = vor.u32 %v1831_v20, %v1563_v19  ;;  %v1829_v24 = vld [vmem:[#allocation4 + $0x44] sm:$0xf0]  ;;  %v1552_v25 = vor.u32 %v1826_v17, %v1549_v18  ;;  %v1824_v26 = vld [vmem:[#allocation4 + $0x24] sm:$0xf] }
  0x2f   : > { %526 = vmatpush.bf16.msra.mxu1 %v1576_v5  ;;  %v1541_v27 = vld [vmem:[#allocation4 + $0x28] sm:$0xf0]  ;;  %s411_s2 = scalar_select %p410_p13, %s2294_s0, 1  ;;  %v1556_v28 = vor.u32 %v1829_v24, %v1555_v22  ;;  %v1547_v29 = vld [vmem:[#allocation4 + $0x30] sm:$0xf]  ;;  %v1843_v54 = vld [vmem:[#allocation7 + $0x38] sm:$0xff] }
  0x30   : > { %v1827_v30 = vld [vmem:[#allocation4 + $0x34] sm:$0xf0]  ;;  %v1544_v31 = vor.u32 %v1824_v26, %v1541_v27  ;;  %v1822_v32 = vld [vmem:[#allocation4 + $0x14] sm:$0xf]  ;;  %v1533_v33 = vld [vmem:[#allocation4 + $0x18] sm:$0xf0]  ;;  %769 = vmatpush.bf16.msra.mxu3 %v1843_v54 }
  0x31   : > { %513 = vmatpush.bf16.msra.mxu0 %v1572_v16  ;;  %s1520_s3 = sshll.u32 %s411_s2, 3  ;;  %v1548_v34 = vor.u32 %v1827_v30, %v1547_v29  ;;  %v1539_v35 = vld [vmem:[#allocation4 + $0x20] sm:$0xf]  ;;  %v1825_v36 = vld [vmem:[#allocation4 + $0x24] sm:$0xf0]  ;;  %v1536_v37 = vor.u32 %v1822_v32, %v1533_v33  ;;  %s2207_s16 = smov 96  }
  0x32   : > { %v1820_v38 = vld [vmem:[#allocation4 + $0x4] sm:$0xf]  ;;  %v1525_v39 = vld [vmem:[#allocation4 + $0x8] sm:$0xf0]  ;;  %s413_s29 = scalar_lea.vmem %s2528_s1, %s1520_s3  ;;  %v1540_v40 = vor.u32 %v1825_v36, %v1539_v35  ;;  %v1531_v41 = vld [vmem:[#allocation4 + $0x10] sm:$0xf] }
  0x33   : > { %527 = vmatpush.bf16.msra.mxu1 %v1568_v12  ;;  %v1823_v42 = vld [vmem:[#allocation4 + $0x14] sm:$0xf0]  ;;  %v1528_v43 = vor.u32 %v1820_v38, %v1525_v39  ;;  %v2366_v44 = vld [vmem:[%s413_s29] sm:$0xff]  ;;  %v1821_v48 = vld [vmem:[#allocation4 + $0x4] sm:$0xf0]  ;;  %s2208_s18 = smov 32  }
  0x34   : > { %v1532_v45 = vor.u32 %v1823_v42, %v1531_v41  ;;  %v2370_v46 = vpack.c.bf16 %v2366_v44, %v2366_v44  ;;  %v1523_v47 = vld [vmem:[#allocation4] sm:$0xf]  ;;  %594 = vrot.lane.b32.xlu2 %v2366_v44, %s2206_s13  ;;  %v1842_v55 = vld [vmem:[#allocation7 + $0x30] sm:$0xff]  ;;  %v1851_v56 = vld [vmem:[#allocation9 + $0x38] sm:$0xff]  ;;  %s538_s19 = sld [smem:[#allocation3]]  ;;  %s407_s15 = sand.u32 1, %s2188_s22  }
  0x35   : > { %514 = vmatpush.bf16.msra.mxu0 %v1564_v23  ;;  %v1524_v49 = vor.u32 %v1821_v48, %v1523_v47  ;;  %770 = vmatpush.bf16.msra.mxu3 %v1842_v55  ;;  %v1841_v57 = vld [vmem:[#allocation7 + $0x28] sm:$0xff]  ;;  %v1850_v58 = vld [vmem:[#allocation9 + $0x30] sm:$0xff]  ;;  %v1840_v59 = vld [vmem:[#allocation7 + $0x20] sm:$0xff]  ;;  %s1716_s3 = sld [smem:[#allocation3 + $0x1]]  ;;  %s1519_s17 = sshll.u32 %s407_s15, 3 }
  0x36   : > { %708 = vmatpush.bf16.msra.mxu2 %v1851_v56  ;;  %v1849_v60 = vld [vmem:[#allocation9 + $0x28] sm:$0xff]  ;;  %v1839_v61 = vld [vmem:[#allocation7 + $0x18] sm:$0xff]  ;;  %v1848_v0 = vld [vmem:[#allocation9 + $0x20] sm:$0xff]  ;;  %s1817_s20 = sshll.u32 %s2294_s0, 3 }
  0x37   : > { %528 = vmatpush.bf16.msra.mxu1 %v1560_v21  ;;  %v1838_v1 = vld [vmem:[#allocation7 + $0x10] sm:$0xff]  ;;  %v1847_v6 = vld [vmem:[#allocation9 + $0x18] sm:$0xff]  ;;  %v1837_v7 = vld [vmem:[#allocation7 + $0x8] sm:$0xff]  ;;  %s1414_s26 = scalar_lea.hbm %s2538_s11, %s1817_s20 }
  0x38   : > { %v1846_v10 = vld [vmem:[#allocation9 + $0x10] sm:$0xff]  ;;  %v1836_v11 = vld [vmem:[#allocation7] sm:$0xff]  ;;  %v1845_v14 = vld [vmem:[#allocation9 + $0x8] sm:$0xff] }
  0x39   : > { %515 = vmatpush.bf16.msra.mxu0 %v1556_v28  ;;  %771 = vmatpush.bf16.msra.mxu3 %v1841_v57  ;;  %v1844_v19 = vld [vmem:[#allocation9] sm:$0xff] }
  0x3a   : > { %709 = vmatpush.bf16.msra.mxu2 %v1850_v58  ;;  %v539_v62 = vstv %s538_s19  ;;  %v1972_v55 = vld [vmem:[%s2533_s6 + $0x2] ss:$0 sm:$0xff]  ;;  %s1404_s19 = scalar_lea.sflag [#allocation6], %s407_s15 }
  0x3b   : > { %529 = vmatpush.bf16.msra.mxu1 %v1552_v25  ;;  %v1686_v39 = vld [vmem:[#allocation4 + $0xc0] sm:$0xf] }
  0x3c   : > { %623 = vrot.lane.b32.xlu2 %v2366_v44, %s2207_s16 }
  0x3d   : > { %516 = vmatpush.bf16.msra.mxu0 %v1548_v34  ;;  %772 = vmatpush.bf16.msra.mxu3 %v1840_v59 }
  0x3e   : > { %710 = vmatpush.bf16.msra.mxu2 %v1849_v60 }
  0x3f   : > { %530 = vmatpush.bf16.msra.mxu1 %v1544_v31 }
  0x41   : > { %517 = vmatpush.bf16.msra.mxu0 %v1540_v40  ;;  %773 = vmatpush.bf16.msra.mxu3 %v1839_v61 }
  0x42   : > { %711 = vmatpush.bf16.msra.mxu2 %v1848_v0 }
  0x43   : > { %531 = vmatpush.bf16.msra.mxu1 %v1536_v37 }
  0x45   : > { %518 = vmatpush.bf16.msra.mxu0 %v1532_v45  ;;  %774 = vmatpush.bf16.msra.mxu3 %v1838_v1  ;;  %v1872_v45 = vld [vmem:[#allocation7 + $0x60] sm:$0xff] }
  0x46   : > { %712 = vmatpush.bf16.msra.mxu2 %v1847_v6 }
  0x47   : > { %532 = vmatpush.bf16.msra.mxu1 %v1528_v43 }
  0x49   : > { %519 = vmatpush.bf16.msra.mxu0 %v1524_v49  ;;  %775 = vmatpush.bf16.msra.mxu3 %v1837_v7 }
  0x4a   : > { %533 = vmatmul.bf16.vlgmr.msra.gmra.mxu1 %v2370_v46  ;;  %713 = vmatpush.bf16.msra.mxu2 %v1846_v10  ;;  %v1710_v10 = vld [vmem:[#allocation4 + $0xf0] sm:$0xf] }
  0x4c   : > { %520 = vmatmul.bf16.vlgmr.msra.gmra.mxu0 %v2370_v46 }
  0x4d   : > { %776 = vmatpush.bf16.msra.mxu3 %v1836_v11  ;;  %v1867_v11 = vld [vmem:[#allocation4 + $0xf4] sm:$0xf0] }
  0x4e   : > { %714 = vmatpush.bf16.msra.mxu2 %v1845_v14  ;;  %v1711_v14 = vor.u32 %v1867_v11, %v1710_v10 }
  0x50   : > { %777 = vmatmul.bf16.vlgmr.msra.gmra.mxu3 %v2370_v46  ;;  %924 = vmatpush.bf16.msrb.mxu0 %v1711_v14  ;;  %v1852_v14 = vld [vmem:[#allocation4 + $0x84] sm:$0xf] }
  0x52   : > { %715 = vmatpush.bf16.msra.mxu2 %v1844_v19 }
  0x8e   : > { %v595_v37 = vpop.permute.xlu2 %594 }
  0x96   : > { %v624_v0 = vpop.permute.xlu2 %623 }
  0xc7   : > { %v534_v50 = vpop.f32.mrf.mxu1 }
  0xc8   : > { %598 = vrot.lane.b32.xlu1 %v534_v50, %s2207_s16  ;;  %541 = vrot.lane.b32.xlu0 %v534_v50, %s2208_s18 }
  0xc9   : > { %v521_v51 = vpop.f32.mrf.mxu0 }
  0xca   : > { %v540_v63 = vadd.f32 %v539_v62, %v521_v51 }
  0xcf   : > { %v536_v52 = vpop.f32.mrf.mxu1 }
  0xd0   : > { %569 = vrot.lane.b32.xlu0 %v534_v50, %s2206_s13  ;;  %566 = vrot.lane.b32.xlu1 %v2366_v44, %s2208_s18  ;;  %v1973_v50 = vld [vmem:[%s2533_s6] ss:$0 sm:$0xff] }
  0xd1   : > { %v523_v53 = vpop.f32.mrf.mxu0 }
  0xd2   : > { %v1971_v53 = vld [vmem:[%s2533_s6 + $0x1] ss:$0 sm:$0xff] }
  0xd3   : > { %v778_v7 = vpop.f32.mrf.mxu3 }
 0x13a   : > { %v599_v2 = vpop.permute.xlu1 %598  ;;  %v542_v3 = vpop.permute.xlu0 %541 }
 0x13b   : > { %v600_v4 = vadd.f32 %v599_v2, %v540_v63  ;;  %v543_v5 = vadd.f32 %v542_v3, %v540_v63 }
 0x13d   : > { %v1587_v8 = vmul.f32 -1.442695, %v600_v4  ;;  %v1585_v9 = vmul.f32 -1.442695, %v543_v5 }
 0x13f   : > { %1982 = vpow2.f32 %v1587_v8  ;;  %v780_v8 = vpop.f32.mrf.mxu3 }
 0x140   : > { %1984 = vpow2.f32 %v1585_v9  ;;  %v1974_v9 = vld [vmem:[%s2532_s5] ss:$0 sm:$0xff]  ;;  %v1869_v8 = vld [vmem:[#allocation7 + $0x48] sm:$0xff] }
 0x142   : > { %v570_v12 = vpop.permute.xlu0 %569  ;;  %v567_v61 = vpop.permute.xlu1 %566 }
 0x143   : > { %v571_v13 = vadd.f32 %v570_v12, %v540_v63  ;;  %v1866_v12 = vld [vmem:[#allocation4 + $0xf4] sm:$0xf] }
 0x145   : > { %v1983_v15 = vpop.eup %1982  ;;  %v1586_v16 = vmul.f32 -1.442695, %v571_v13 }
 0x146   : > { %v1985_v17 = vpop.eup %1984  ;;  %v604_v18 = vadd.f32 1.0, %v1983_v15  ;;  %v1712_v15 = vld [vmem:[#allocation4 + $0xf8] sm:$0xf0] }
 0x147   : > { %v547_v20 = vadd.f32 1.0, %v1985_v17  ;;  %1986 = vpow2.f32 %v1586_v16  ;;  %v1875_v16 = vld [vmem:[#allocation7 + $0x78] sm:$0xff] }
 0x148   : > { %1988 = vrcp.f32 %v604_v18  ;;  %v616_v38 = vand.u32 2147483648, %v604_v18  ;;  %vm610_vm4 = vweird.f32 %v604_v18  ;;  %v614_v41 = vand.u32 2147483647, %v604_v18  ;;  %1183 = vmatpush.bf16.msrb.mxu3 %v1875_v16 }
 0x149   : > { %1990 = vrcp.f32 %v547_v20  ;;  %vm553_vm1 = vweird.f32 %v547_v20  ;;  %v557_v32 = vand.u32 2147483647, %v547_v20  ;;  %v559_v33 = vand.u32 2147483648, %v547_v20 }
 0x14a   : > { %v617_v51 = vor.u32 1.1754944e-38, %v616_v38  ;;  %vm615_vm9 = vcmp.eq.f32.partialorder %v614_v41, 8.507059e+37 }
 0x14b   : > { %vm558_vm6 = vcmp.eq.f32.partialorder %v557_v32, 8.507059e+37  ;;  %v560_v46 = vor.u32 1.1754944e-38, %v559_v33  ;;  %v1862_v32 = vld [vmem:[#allocation4 + $0xd4] sm:$0xf]  ;;  %v1696_v33 = vld [vmem:[#allocation4 + $0xd8] sm:$0xf0] }
 0x14d   : > { %v1987_v21 = vpop.eup %1986 }
 0x14e   : > { %v1989_v22 = vpop.eup %1988  ;;  %v575_v23 = vadd.f32 1.0, %v1987_v21  ;;  %v1865_v21 = vld [vmem:[#allocation4 + $0xe4] sm:$0xf0] }
 0x14f   : > { %v1991_v24 = vpop.eup %1990  ;;  %v606_v25 = vmul.f32 %v1989_v22, %v604_v18  ;;  %vm611_vm2 = vweird.f32 %v1989_v22  ;;  %v1715_v18 = vor.u32 %v1866_v12, %v1712_v15  ;;  %v1654_v12 = vld [vmem:[#allocation4 + $0x80] sm:$0xf] }
 0x150   : > { %1992 = vrcp.f32 %v575_v23  ;;  %v549_v27 = vmul.f32 %v1991_v24, %v547_v20  ;;  %vm554_vm0 = vweird.f32 %v1991_v24  ;;  %v587_v43 = vand.u32 2147483648, %v575_v23  ;;  %vm2390_vm5 = vmor %vm610_vm4, %vm611_vm2  ;;  %v1702_v20 = vld [vmem:[#allocation4 + $0xe0] sm:$0xf] }
 0x151   : > { %v607_v26 = vsub.f32 1.0, %v606_v25  ;;  %vm2384_vm3 = vmor %vm553_vm1, %vm554_vm0  ;;  %v585_v48 = vand.u32 2147483647, %v575_v23  ;;  %vm581_vm8 = vweird.f32 %v575_v23  ;;  %937 = vmatpush.bf16.msrb.mxu1 %v1715_v18  ;;  %v1874_v25 = vld [vmem:[#allocation7 + $0x70] sm:$0xff]  ;;  %v1868_v18 = vld [vmem:[#allocation7 + $0x40] sm:$0xff] }
 0x152   : > { %v550_v29 = vsub.f32 1.0, %v549_v27  ;;  %v588_v56 = vor.u32 1.1754944e-38, %v587_v43  ;;  %1184 = vmatpush.bf16.msrb.mxu3 %v1874_v25  ;;  %v1688_v43 = vld [vmem:[#allocation4 + $0xc8] sm:$0xf0] }
 0x153   : > { %v608_v28 = vmul.f32 %v1989_v22, %v607_v26  ;;  %vm586_vm11 = vcmp.eq.f32.partialorder %v585_v48, 8.507059e+37  ;;  %v1859_v48 = vld [vmem:[#allocation4 + $0xb4] sm:$0xf0] }
 0x154   : > { %v551_v30 = vmul.f32 %v1991_v24, %v550_v29  ;;  %v1694_v29 = vld [vmem:[#allocation4 + $0xd0] sm:$0xf] }
 0x155   : > { %v609_v35 = vadd.f32 %v1989_v22, %v608_v28 }
 0x156   : > { %v1993_v31 = vpop.eup %1992  ;;  %v552_v36 = vadd.f32 %v1991_v24, %v551_v30 }
 0x157   : > { %v577_v34 = vmul.f32 %v1993_v31, %v575_v23  ;;  %vm582_vm7 = vweird.f32 %v1993_v31  ;;  %v613_v49 = vsel %vm2390_vm5, %v1989_v22, %v609_v35  ;;  %v1864_v22 = vld [vmem:[#allocation4 + $0xe4] sm:$0xf]  ;;  %v1703_v23 = vor.u32 %v1865_v21, %v1702_v20 }
 0x158   : > { %v556_v42 = vsel %vm2384_vm3, %v1991_v24, %v552_v36  ;;  %vm583_vm10 = vmor %vm581_vm8, %vm582_vm7  ;;  %v618_v57 = vsel %vm615_vm9, %v617_v51, %v613_v49  ;;  %v1704_v24 = vld [vmem:[#allocation4 + $0xe8] sm:$0xf0]  ;;  %v1699_v36 = vor.u32 %v1862_v32, %v1696_v33  ;;  %v1680_v51 = vld [vmem:[#allocation4 + $0xb8] sm:$0xf0] }
 0x159   : > { %v578_v40 = vsub.f32 1.0, %v577_v34  ;;  %v561_v52 = vsel %vm558_vm6, %v560_v46, %v556_v42  ;;  %v622_v63 = vmul.f32 %v1972_v55, %v618_v57  ;;  %v1707_v27 = vor.u32 %v1864_v22, %v1704_v24  ;;  %925 = vmatpush.bf16.msrb.mxu0 %v1703_v23  ;;  %v1860_v42 = vld [vmem:[#allocation4 + $0xc4] sm:$0xf]  ;;  %v1670_v55 = vld [vmem:[#allocation4 + $0xa0] sm:$0xf] }
 0x15a   : > { %v565_v59 = vmul.f32 %v1973_v50, %v561_v52  ;;  %v1691_v46 = vor.u32 %v1860_v42, %v1688_v43  ;;  %v1858_v50 = vld [vmem:[#allocation4 + $0xb4] sm:$0xf]  ;;  %v1871_v52 = vld [vmem:[#allocation7 + $0x58] sm:$0xff]  ;;  %v1856_v57 = vld [vmem:[#allocation4 + $0xa4] sm:$0xf] }
 0x15b   : > { %v579_v47 = vmul.f32 %v1993_v31, %v578_v40  ;;  %v625_v3 = vmul.f32 %v624_v0, %v622_v63  ;;  %938 = vmatpush.bf16.msrb.mxu1 %v1707_v27  ;;  %v1861_v40 = vld [vmem:[#allocation4 + $0xc4] sm:$0xf0] }
 0x15c   : > { %v568_v2 = vmul.f32 %v567_v61, %v565_v59  ;;  %v1687_v41 = vor.u32 %v1861_v40, %v1686_v39  ;;  %v1870_v61 = vld [vmem:[#allocation7 + $0x50] sm:$0xff] }
 0x15d   : > { %v580_v54 = vadd.f32 %v1993_v31, %v579_v47  ;;  %v1678_v47 = vld [vmem:[#allocation4 + $0xb0] sm:$0xf] }
 0x15e   : > { %v1679_v49 = vor.u32 %v1859_v48, %v1678_v47 }
 0x15f   : > { %v584_v58 = vsel %vm583_vm10, %v1993_v31, %v580_v54  ;;  %v1863_v31 = vld [vmem:[#allocation4 + $0xd4] sm:$0xf0]  ;;  %939 = vmatpush.bf16.msrb.mxu1 %v1699_v36 }
 0x160   : > { %v589_v60 = vsel %vm586_vm11, %v588_v56, %v584_v58  ;;  %v1695_v35 = vor.u32 %v1863_v31, %v1694_v29  ;;  %v1857_v56 = vld [vmem:[#allocation4 + $0xa4] sm:$0xf0] }
 0x161   : > { %v593_v62 = vmul.f32 %v1971_v53, %v589_v60  ;;  %v1683_v53 = vor.u32 %v1858_v50, %v1680_v51  ;;  %v1671_v59 = vor.u32 %v1857_v56, %v1670_v55  ;;  %v1672_v60 = vld [vmem:[#allocation4 + $0xa8] sm:$0xf0] }
 0x162   : > { %926 = vmatpush.bf16.msrb.mxu0 %v1695_v35  ;;  %v1881_v56 = vld [vmem:[#allocation9 + $0x68] sm:$0xff] }
 0x163   : > { %v596_v1 = vmul.f32 %v595_v37, %v593_v62  ;;  %v1873_v37 = vld [vmem:[#allocation7 + $0x68] sm:$0xff]  ;;  %940 = vmatpush.bf16.msrb.mxu1 %v1691_v46  ;;  %v1675_v62 = vor.u32 %v1856_v57, %v1672_v60  ;;  %v1880_v57 = vld [vmem:[#allocation9 + $0x60] sm:$0xff] }
 0x164   : > { %1185 = vmatpush.bf16.msrb.mxu3 %v1873_v37 }
 0x165   : > { %v597_v4 = vadd.f32 %v596_v1, %v568_v2  ;;  %v1662_v1 = vld [vmem:[#allocation4 + $0x90] sm:$0xf]  ;;  %v1855_v2 = vld [vmem:[#allocation4 + $0x94] sm:$0xf0] }
 0x166   : > { %927 = vmatpush.bf16.msrb.mxu0 %v1687_v41 }
 0x167   : > { %v626_v5 = vadd.f32 %v625_v3, %v597_v4  ;;  %941 = vmatpush.bf16.msrb.mxu1 %v1683_v53  ;;  %v1854_v3 = vld [vmem:[#allocation4 + $0x94] sm:$0xf] }
 0x168   : > { %1186 = vmatpush.bf16.msrb.mxu3 %v1872_v45 }
 0x169   : > { %v643_v6 = vpack.c.bf16 %v626_v5, %v626_v5 }
 0x16a   : > { %928 = vmatpush.bf16.msrb.mxu0 %v1679_v49  ;;  %v951_v49 = vstv %s1716_s3 }
 0x16b   : > { %716 = vmatmul.bf16.vlgmr.msra.gmra.mxu2 %v643_v6  ;;  %942 = vmatpush.bf16.msrb.mxu1 %v1675_v62  ;;  %v1663_v6 = vor.u32 %v1855_v2, %v1662_v1  ;;  %v1877_v2 = vld [vmem:[#allocation9 + $0x48] sm:$0xff] }
 0x16c   : > { %1187 = vmatpush.bf16.msrb.mxu3 %v1871_v52  ;;  %v1883_v52 = vld [vmem:[#allocation9 + $0x78] sm:$0xff] }
 0x16d   : > { %1122 = vmatpush.bf16.msrb.mxu2 %v1883_v52 }
 0x16e   : > { %929 = vmatpush.bf16.msrb.mxu0 %v1671_v59  ;;  %v1879_v59 = vld [vmem:[#allocation9 + $0x58] sm:$0xff] }
 0x170   : > { %1188 = vmatpush.bf16.msrb.mxu3 %v1870_v61  ;;  %v1878_v61 = vld [vmem:[#allocation9 + $0x50] sm:$0xff] }
 0x172   : > { %930 = vmatpush.bf16.msrb.mxu0 %v1663_v6 }
 0x174   : > { %1189 = vmatpush.bf16.msrb.mxu3 %v1869_v8 }
 0x178   : > { %1190 = vmatpush.bf16.msrb.mxu3 %v1868_v18 }
 0x1ee   : > { %v717_v13 = vpop.f32.mrf.mxu2 }
 0x1ef   : > { %v779_v17 = vadd.f32 %v778_v7, %v717_v13  ;;  %v1664_v7 = vld [vmem:[#allocation4 + $0x98] sm:$0xf0]  ;;  %v1853_v13 = vld [vmem:[#allocation4 + $0x84] sm:$0xf0] }
 0x1f0   : > { %v1655_v16 = vor.u32 %v1853_v13, %v1654_v12 }
 0x1f1   : > { %v2408_v19 = vadd.f32 %v1974_v9, %v779_v17  ;;  %v1667_v9 = vor.u32 %v1854_v3, %v1664_v7  ;;  %v1656_v17 = vld [vmem:[#allocation4 + $0x88] sm:$0xf0] }
 0x1f2   : > { %v1659_v22 = vor.u32 %v1852_v14, %v1656_v17  ;;  %931 = vmatpush.bf16.msrb.mxu0 %v1655_v16 }
 0x1f3   : > { %v2411_v26 = vmul.f32 0.70710677, %v2408_v19  ;;  %943 = vmatpush.bf16.msrb.mxu1 %v1667_v9  ;;  %v785_v41 = vmul.f32 0.5, %v2408_v19 }
 0x1f5   : > { %v2414_v28 = vand.u32 2147483647, %v2411_v26  ;;  %vm820_vm0 = vcmp.ge.f32.partialorder %v2411_v26, 0.0 }
 0x1f6   : > { %v719_v30 = vpop.f32.mrf.mxu2 }
 0x1f7   : > { %v788_v34 = vmul.f32 0.3275911, %v2414_v28  ;;  %v814_v21 = vsub.f32 0.0, %v2414_v28  ;;  %944 = vmatpush.bf16.msrb.mxu1 %v1659_v22 }
 0x1f9   : > { %v789_v38 = vadd.f32 1.0, %v788_v34  ;;  %v815_v25 = vmul.f32 %v814_v21, %v2414_v28 }
 0x1fb   : > { %1994 = vrcp.f32 %v789_v38  ;;  %v801_v0 = vand.u32 2147483648, %v789_v38  ;;  %v799_v5 = vand.u32 2147483647, %v789_v38  ;;  %vm795_vm13 = vweird.f32 %v789_v38 }
 0x1fc   : > { %v816_v30 = vmul.f32 1.442695, %v815_v25 }
 0x1fd   : > { %v802_v11 = vor.u32 1.1754944e-38, %v801_v0  ;;  %vm800_vm15 = vcmp.eq.f32.partialorder %v799_v5, 8.507059e+37  ;;  %v1876_v5 = vld [vmem:[#allocation9 + $0x40] sm:$0xff] }
 0x1fe   : > { %1996 = vpow2.f32 %v816_v30 }
 0x201   : > { %v1995_v54 = vpop.eup %1994 }
 0x202   : > { %v791_v58 = vmul.f32 %v1995_v54, %v789_v38  ;;  %vm796_vm12 = vweird.f32 %v1995_v54 }
 0x203   : > { %vm797_vm14 = vmor %vm795_vm13, %vm796_vm12 }
 0x204   : > { %v792_v63 = vsub.f32 1.0, %v791_v58  ;;  %v1997_v36 = vpop.eup %1996 }
 0x206   : > { %v793_v4 = vmul.f32 %v1995_v54, %v792_v63 }
 0x208   : > { %v794_v10 = vadd.f32 %v1995_v54, %v793_v4 }
 0x20a   : > { %v798_v15 = vsel %vm797_vm14, %v1995_v54, %v794_v10  ;;  %v1882_v54 = vld [vmem:[#allocation9 + $0x70] sm:$0xff] }
 0x20b   : > { %v803_v20 = vsel %vm800_vm15, %v802_v11, %v798_v15  ;;  %1123 = vmatpush.bf16.msrb.mxu2 %v1882_v54 }
 0x20c   : > { %v805_v23 = vmul.f32 1.0614054, %v803_v20 }
 0x20e   : > { %v806_v24 = vadd.f32 -1.4531521, %v805_v23 }
 0x20f   : > { %1124 = vmatpush.bf16.msrb.mxu2 %v1881_v56 }
 0x210   : > { %v807_v27 = vmul.f32 %v806_v24, %v803_v20 }
 0x212   : > { %v808_v29 = vadd.f32 1.4214138, %v807_v27 }
 0x213   : > { %1125 = vmatpush.bf16.msrb.mxu2 %v1880_v57 }
 0x214   : > { %v809_v31 = vmul.f32 %v808_v29, %v803_v20 }
 0x216   : > { %v810_v32 = vadd.f32 -0.28449672, %v809_v31 }
 0x217   : > { %1126 = vmatpush.bf16.msrb.mxu2 %v1879_v59  ;;  %v1891_v59 = vld [vmem:[%s2534_s7 + $0x38] sm:$0xff] }
 0x218   : > { %v811_v33 = vmul.f32 %v810_v32, %v803_v20  ;;  %1309 = vmatpush.bf16.msra.mxu0 %v1891_v59 }
 0x21a   : > { %v812_v34 = vadd.f32 0.2548296, %v811_v33 }
 0x21b   : > { %1127 = vmatpush.bf16.msrb.mxu2 %v1878_v61 }
 0x21c   : > { %v813_v35 = vmul.f32 %v812_v34, %v803_v20 }
 0x21e   : > { %v818_v37 = vmul.f32 %v1997_v36, %v813_v35  ;;  %v1976_v35 = vld [vmem:[%s2533_s6 + $0x4] ss:$0 sm:$0xff] }
 0x21f   : > { %1128 = vmatpush.bf16.msrb.mxu2 %v1877_v2  ;;  %v1889_v2 = vld [vmem:[%s2534_s7 + $0x28] sm:$0xff] }
 0x220   : > { %v819_v38 = vsub.f32 1.0, %v818_v37  ;;  %v1975_v37 = vld [vmem:[%s2533_s6 + $0x5] ss:$0 sm:$0xff] }
 0x222   : > { %v821_v39 = vsub.f32 0.0, %v819_v38 }
 0x223   : > { %1129 = vmatpush.bf16.msrb.mxu2 %v1876_v5 }
 0x224   : > { %v822_v40 = vsel %vm820_vm0, %v819_v38, %v821_v39  ;;  %v1977_v39 = vld [vmem:[%s2533_s6 + $0x3] ss:$0 sm:$0xff] }
 0x225   : > { %v823_v42 = vadd.f32 1.0, %v822_v40 }
 0x227   : > { %v824_v28 = vmul.f32 %v823_v42, %v785_v41 }
 0x229   : > { %v2423_v43 = vadd.f32 %v824_v28, %v2366_v44 }
 0x22b   : > { %v826_v45 = vpack.c.bf16 %v2423_v43, %v2423_v43 }
 0x22d   : > { %932 = vmatmul.bf16.vlgmr.msrb.gmra.mxu0 %v826_v45  ;;  %945 = vmatmul.bf16.vlgmr.msrb.gmra.mxu1 %v826_v45 }
 0x22e   : > { %1191 = vmatmul.bf16.vlgmr.msrb.gmra.mxu3 %v826_v45 }
 0x2aa   : > { %v933_v46 = vpop.f32.mrf.mxu0  ;;  %v946_v47 = vpop.f32.mrf.mxu1 }
 0x2ab   : > { %1010 = vrot.lane.b32.xlu2 %v946_v47, %s2207_s16  ;;  %981 = vrot.lane.b32.xlu1 %v946_v47, %s2206_s13  ;;  %v952_v51 = vadd.f32 %v951_v49, %v933_v46 }
 0x2ac   : > { %953 = vrot.lane.b32.xlu0 %v946_v47, %s2208_s18 }
 0x2b1   : > { %v2430_v19 = vpop.f32.mrf.mxu3 }
 0x2b2   : > { %v935_v26 = vpop.f32.mrf.mxu0  ;;  %v948_v48 = vpop.f32.mrf.mxu1 }
 0x2b3   : > { %1035 = vrot.lane.b32.xlu2 %v2423_v43, %s2207_s16  ;;  %1006 = vrot.lane.b32.xlu1 %v2423_v43, %s2206_s13  ;;  %s409_s16 = scalar_lea.vmem [#allocation10], %s1519_s17  ;;  %s2144_s17 = scalar_lea.hbm %s2538_s11, 16 }
 0x2b4   : > { %978 = vrot.lane.b32.xlu0 %v2423_v43, %s2208_s18  ;;  %s1416_s0 = sshll.u32 %s409_s16, 4  ;;  %s1418_s18 = sshll.u32 %s1414_s26, 4  ;;  %s1417_s0 = int_to_ptr.vmem [resolvable:$true] %s1416_s0  ;;  %s1419_s18 = int_to_ptr.hbm [resolvable:$true] %s1418_s18 }
 0x2b5   : > { %s2138_s27 = sshra.s32 %s1419_s18, 4  ;;  %s2139_s27 = int_to_ptr.hbm [resolvable:$true] %s2138_s27 }
 0x2b6   : > { %s2140_s28 = scalar_lea.hbm %s2139_s27, 8  ;;  %p2145_p3 = scmp.lt.s32.totalorder %s2139_s27, %s2538_s11 }
 0x2b7   : > { %p2141_p0 = scmp.ne.s32.totalorder %s2139_s27, %s2140_s28  ;;  %p2146_p4 = scmp.lt.s32.totalorder %s2144_s17, %s2140_s28 }
 0x2b9   : > { %v1194_v44 = vpop.f32.mrf.mxu3  ;;  %p2142_p1 = pnand %p2141_p0, %p2311_p5  ;;  %p2147_p7 = por %p2146_p4, %p2145_p3 }
 0x2bb   : > { %p2143_p2 = pneg %p2142_p1 }
 0x2bd   : > { %p2148_p8 = pnand %p2147_p7, %p2143_p2 }
 0x305   : > { %v1011_v50 = vpop.permute.xlu2 %1010 }
 0x306   : > { %v1012_v53 = vadd.f32 %v1011_v50, %v952_v51 }
 0x308   : > { %v1719_v55 = vmul.f32 -1.442695, %v1012_v53 }
 0x30a   : > { %1998 = vpow2.f32 %v1719_v55 }
 0x30d   : > { %v1036_v53 = vpop.permute.xlu2 %1035 }
 0x310   : > { %v1999_v58 = vpop.eup %1998 }
 0x311   : > { %v1016_v60 = vadd.f32 1.0, %v1999_v58  ;;  %v1978_v58 = vld [vmem:[%s2532_s5 + $0x1] ss:$0 sm:$0xff] }
 0x313   : > { %2000 = vrcp.f32 %v1016_v60  ;;  %v1028_v20 = vand.u32 2147483648, %v1016_v60  ;;  %vm1022_vm2 = vweird.f32 %v1016_v60  ;;  %v1026_v22 = vand.u32 2147483647, %v1016_v60 }
 0x315   : > { %v1029_v34 = vor.u32 1.1754944e-38, %v1028_v20  ;;  %vm1027_vm7 = vcmp.eq.f32.partialorder %v1026_v22, 8.507059e+37 }
 0x319   : > { %v2001_v6 = vpop.eup %2000 }
 0x31a   : > { %v1018_v7 = vmul.f32 %v2001_v6, %v1016_v60  ;;  %vm1023_vm1 = vweird.f32 %v2001_v6 }
 0x31b   : > { %vm2438_vm3 = vmor %vm1022_vm2, %vm1023_vm1 }
 0x31c   : > { %v1019_v12 = vsub.f32 1.0, %v1018_v7 }
 0x31d   : > { %v982_v62 = vpop.permute.xlu1 %981 }
 0x31e   : > { %v983_v63 = vadd.f32 %v982_v62, %v952_v51  ;;  %v954_v0 = vpop.permute.xlu0 %953  ;;  %v1020_v13 = vmul.f32 %v2001_v6, %v1019_v12  ;;  %v1885_v12 = vld [vmem:[%s2534_s7 + $0x8] sm:$0xff] }
 0x31f   : > { %v955_v1 = vadd.f32 %v954_v0, %v952_v51 }
 0x320   : > { %v1718_v3 = vmul.f32 -1.442695, %v983_v63  ;;  %v1021_v17 = vadd.f32 %v2001_v6, %v1020_v13  ;;  %v1890_v63 = vld [vmem:[%s2534_s7 + $0x30] sm:$0xff] }
 0x321   : > { %v1717_v4 = vmul.f32 -1.442695, %v955_v1  ;;  %1310 = vmatpush.bf16.msra.mxu0 %v1890_v63 }
 0x322   : > { %2002 = vpow2.f32 %v1718_v3  ;;  %v1025_v31 = vsel %vm2438_vm3, %v2001_v6, %v1021_v17  ;;  %v1887_v6 = vld [vmem:[%s2534_s7 + $0x18] sm:$0xff] }
 0x323   : > { %2004 = vpow2.f32 %v1717_v4  ;;  %v1030_v41 = vsel %vm1027_vm7, %v1029_v34, %v1025_v31  ;;  %vm1362_vm7 = vcmask 261120  }
 0x324   : > { %v1034_v48 = vmul.f32 %v1975_v37, %v1030_v41 }
 0x325   : > { %v1007_v44 = vpop.permute.xlu1 %1006  ;;  %1311 = vmatpush.bf16.msra.mxu0 %v1889_v2 }
 0x326   : > { %v979_v51 = vpop.permute.xlu0 %978  ;;  %v1037_v54 = vmul.f32 %v1036_v53, %v1034_v48 }
 0x328   : > { %v2003_v8 = vpop.eup %2002 }
 0x329   : > { %v2005_v9 = vpop.eup %2004  ;;  %v987_v10 = vadd.f32 1.0, %v2003_v8  ;;  %v1886_v8 = vld [vmem:[%s2534_s7 + $0x10] sm:$0xff] }
 0x32a   : > { %v959_v11 = vadd.f32 1.0, %v2005_v9 }
 0x32b   : > { %2006 = vrcp.f32 %v987_v10  ;;  %v999_v23 = vand.u32 2147483648, %v987_v10  ;;  %v997_v29 = vand.u32 2147483647, %v987_v10  ;;  %vm993_vm6 = vweird.f32 %v987_v10 }
 0x32c   : > { %2008 = vrcp.f32 %v959_v11  ;;  %v971_v30 = vand.u32 2147483648, %v959_v11  ;;  %v969_v33 = vand.u32 2147483647, %v959_v11  ;;  %vm965_vm9 = vweird.f32 %v959_v11 }
 0x32d   : > { %v1000_v38 = vor.u32 1.1754944e-38, %v999_v23  ;;  %vm998_vm10 = vcmp.eq.f32.partialorder %v997_v29, 8.507059e+37 }
 0x32e   : > { %v972_v28 = vor.u32 1.1754944e-38, %v971_v30  ;;  %vm970_vm12 = vcmp.eq.f32.partialorder %v969_v33, 8.507059e+37 }
 0x331   : > { %v2007_v14 = vpop.eup %2006 }
 0x332   : > { %v2009_v15 = vpop.eup %2008  ;;  %v989_v16 = vmul.f32 %v2007_v14, %v987_v10  ;;  %vm994_vm4 = vweird.f32 %v2007_v14 }
 0x333   : > { %v961_v18 = vmul.f32 %v2009_v15, %v959_v11  ;;  %vm966_vm5 = vweird.f32 %v2009_v15  ;;  %vm995_vm8 = vmor %vm993_vm6, %vm994_vm4 }
 0x334   : > { %v990_v21 = vsub.f32 1.0, %v989_v16  ;;  %vm967_vm11 = vmor %vm965_vm9, %vm966_vm5 }
 0x335   : > { %v962_v24 = vsub.f32 1.0, %v961_v18 }
 0x336   : > { %v991_v27 = vmul.f32 %v2007_v14, %v990_v21 }
 0x337   : > { %v963_v32 = vmul.f32 %v2009_v15, %v962_v24 }
 0x338   : > { %v992_v36 = vadd.f32 %v2007_v14, %v991_v27 }
 0x339   : > { %v964_v40 = vadd.f32 %v2009_v15, %v963_v32 }
 0x33a   : > { %v996_v42 = vsel %vm995_vm8, %v2007_v14, %v992_v36 }
 0x33b   : > { %v1001_v45 = vsel %vm998_vm10, %v1000_v38, %v996_v42  ;;  %v968_v46 = vsel %vm967_vm11, %v2009_v15, %v964_v40  ;;  %v1884_v15 = vld [vmem:[%s2534_s7] sm:$0xff] }
 0x33c   : > { %v1005_v47 = vmul.f32 %v1976_v35, %v1001_v45  ;;  %v973_v26 = vsel %vm970_vm12, %v972_v28, %v968_v46  ;;  %v1979_v46 = vld [vmem:[%s2535_s8] ss:$0 sm:$0xff] }
 0x33d   : > { %v977_v49 = vmul.f32 %v1977_v39, %v973_v26 }
 0x33e   : > { %v1008_v50 = vmul.f32 %v1007_v44, %v1005_v47 }
 0x33f   : > { %v980_v52 = vmul.f32 %v979_v51, %v977_v49 }
 0x341   : > { %v1009_v55 = vadd.f32 %v1008_v50, %v980_v52 }
 0x343   : > { %v1038_v56 = vadd.f32 %v1037_v54, %v1009_v55 }
 0x345   : > { %v1056_v57 = vpack.c.bf16 %v1038_v56, %v1038_v56 }
 0x347   : > { %1130 = vmatmul.bf16.vlgmr.msrb.gmra.mxu2 %v1056_v57 }
 0x3ca   : > { %v1131_v60 = vpop.f32.mrf.mxu2 }
 0x3cb   : > { %v1193_v61 = vadd.f32 %v2430_v19, %v1131_v60  ;;  %v1888_v19 = vld [vmem:[%s2534_s7 + $0x20] sm:$0xff] }
 0x3cc   : > { %1312 = vmatpush.bf16.msra.mxu0 %v1888_v19 }
 0x3cd   : > { %v1198_v62 = vadd.f32 %v1978_v58, %v1193_v61 }
 0x3cf   : > { %v1200_v0 = vmul.f32 0.70710677, %v1198_v62  ;;  %v1199_v40 = vmul.f32 0.5, %v1198_v62 }
 0x3d0   : > { %1313 = vmatpush.bf16.msra.mxu0 %v1887_v6 }
 0x3d1   : > { %v1201_v1 = vand.u32 2147483647, %v1200_v0  ;;  %vm1234_vm1 = vcmp.ge.f32.partialorder %v1200_v0, 0.0 }
 0x3d2   : > { %v1133_v3 = vpop.f32.mrf.mxu2 }
 0x3d3   : > { %v1202_v4 = vmul.f32 0.3275911, %v1201_v1  ;;  %v1228_v21 = vsub.f32 0.0, %v1201_v1 }
 0x3d4   : > { %1314 = vmatpush.bf16.msra.mxu0 %v1886_v8 }
 0x3d5   : > { %v1203_v5 = vadd.f32 1.0, %v1202_v4  ;;  %v1229_v24 = vmul.f32 %v1228_v21, %v1201_v1 }
 0x3d7   : > { %2010 = vrcp.f32 %v1203_v5  ;;  %v1215_v11 = vand.u32 2147483648, %v1203_v5  ;;  %v1213_v14 = vand.u32 2147483647, %v1203_v5  ;;  %vm1209_vm14 = vweird.f32 %v1203_v5 }
 0x3d8   : > { %1315 = vmatpush.bf16.msra.mxu0 %v1885_v12  ;;  %v1230_v29 = vmul.f32 1.442695, %v1229_v24 }
 0x3d9   : > { %v1216_v17 = vor.u32 1.1754944e-38, %v1215_v11  ;;  %vm1214_vm0 = vcmp.eq.f32.partialorder %v1213_v14, 8.507059e+37 }
 0x3da   : > { %2012 = vpow2.f32 %v1230_v29 }
 0x3dc   : > { %1316 = vmatpush.bf16.msra.mxu0 %v1884_v15 }
 0x3dd   : > { %v2011_v7 = vpop.eup %2010 }
 0x3de   : > { %v1205_v9 = vmul.f32 %v2011_v7, %v1203_v5  ;;  %vm1210_vm13 = vweird.f32 %v2011_v7 }
 0x3df   : > { %vm1211_vm15 = vmor %vm1209_vm14, %vm1210_vm13 }
 0x3e0   : > { %v1206_v10 = vsub.f32 1.0, %v1205_v9  ;;  %v2013_v35 = vpop.eup %2012 }
 0x3e2   : > { %v1207_v13 = vmul.f32 %v2011_v7, %v1206_v10 }
 0x3e4   : > { %v1208_v16 = vadd.f32 %v2011_v7, %v1207_v13 }
 0x3e6   : > { %v1212_v18 = vsel %vm1211_vm15, %v2011_v7, %v1208_v16 }
 0x3e7   : > { %v1217_v20 = vsel %vm1214_vm0, %v1216_v17, %v1212_v18  ;;  %v2209_v17 = vmov 32.0  }
 0x3e8   : > { %v1219_v22 = vmul.f32 1.0614054, %v1217_v20 }
 0x3ea   : > { %v1220_v23 = vadd.f32 -1.4531521, %v1219_v22 }
 0x3ec   : > { %v1221_v25 = vmul.f32 %v1220_v23, %v1217_v20 }
 0x3ee   : > { %v1222_v27 = vadd.f32 1.4214138, %v1221_v25 }
 0x3f0   : > { %v1223_v30 = vmul.f32 %v1222_v27, %v1217_v20 }
 0x3f2   : > { %v1224_v31 = vadd.f32 -0.28449672, %v1223_v30 }
 0x3f4   : > { %v1225_v32 = vmul.f32 %v1224_v31, %v1217_v20 }
 0x3f6   : > { %v1226_v33 = vadd.f32 0.2548296, %v1225_v32 }
 0x3f8   : > { %v1227_v34 = vmul.f32 %v1226_v33, %v1217_v20 }
 0x3fa   : > { %v1232_v36 = vmul.f32 %v2013_v35, %v1227_v34 }
 0x3fc   : > { %v1233_v37 = vsub.f32 1.0, %v1232_v36 }
 0x3fe   : > { %v1235_v38 = vsub.f32 0.0, %v1233_v37 }
 0x400   : > { %v1236_v39 = vsel %vm1234_vm1, %v1233_v37, %v1235_v38 }
 0x401   : > { %v1237_v41 = vadd.f32 1.0, %v1236_v39 }
 0x403   : > { %v1238_v42 = vmul.f32 %v1237_v41, %v1199_v40  ;;  %v1980_v41 = vld [vmem:[%s2536_s9] ss:$0 sm:$0xff] }
 0x405   : > { %v1239_v28 = vadd.f32 %v1238_v42, %v2423_v43 }
 0x407   : > { %v1240_v45 = vpack.c.bf16 %v1239_v28, %v1239_v28 }
 0x409   : > { %1317 = vmatmul.bf16.vlgmr.msra.gmra.mxu0 %v1240_v45  ;;  %v1981_v45 = vld [vmem:[%s2537_s10] ss:$0 sm:$0xff] }
 0x486   : > { %v1318_v47 = vpop.f32.mrf.mxu0 }
 0x487   : > { %v1319_v26 = vadd.f32 %v1979_v46, %v1318_v47 }
 0x489   : > { %v1323_v48 = vmul.f32 0.70710677, %v1319_v26  ;;  %v1322_v13 = vmul.f32 0.5, %v1319_v26 }
 0x48b   : > { %v1324_v44 = vand.u32 2147483647, %v1323_v48  ;;  %vm1357_vm6 = vcmp.ge.f32.partialorder %v1323_v48, 0.0 }
 0x48d   : > { %v1325_v49 = vmul.f32 0.3275911, %v1324_v44  ;;  %v1351_v60 = vsub.f32 0.0, %v1324_v44 }
 0x48e   : > { %v1320_v50 = vpop.f32.mrf.mxu0 }
 0x48f   : > { %v1326_v51 = vadd.f32 1.0, %v1325_v49  ;;  %v1352_v0 = vmul.f32 %v1351_v60, %v1324_v44 }
 0x491   : > { %2014 = vrcp.f32 %v1326_v51  ;;  %v1338_v55 = vand.u32 2147483648, %v1326_v51  ;;  %v1336_v43 = vand.u32 2147483647, %v1326_v51  ;;  %vm1332_vm3 = vweird.f32 %v1326_v51 }
 0x492   : > { %v1353_v3 = vmul.f32 1.442695, %v1352_v0 }
 0x493   : > { %v1339_v58 = vor.u32 1.1754944e-38, %v1338_v55  ;;  %vm1337_vm5 = vcmp.eq.f32.partialorder %v1336_v43, 8.507059e+37 }
 0x494   : > { %2016 = vpow2.f32 %v1353_v3 }
 0x495   : > { %2018 = vrcp.f32 %v2209_v17 }
 0x497   : > { %v2015_v52 = vpop.eup %2014 }
 0x498   : > { %v1328_v53 = vmul.f32 %v2015_v52, %v1326_v51  ;;  %vm1333_vm2 = vweird.f32 %v2015_v52 }
 0x499   : > { %vm1334_vm4 = vmor %vm1332_vm3, %vm1333_vm2 }
 0x49a   : > { %v1329_v54 = vsub.f32 1.0, %v1328_v53  ;;  %v2017_v8 = vpop.eup %2016 }
 0x49b   : > { %v2019_v18 = vpop.eup %2018 }
 0x49c   : > { %v1330_v56 = vmul.f32 %v2015_v52, %v1329_v54  ;;  %v1367_v20 = vmul.f32 32.0, %v2019_v18  ;;  %vm1371_vm8 = vweird.f32 %v2019_v18 }
 0x49e   : > { %v1331_v57 = vadd.f32 %v2015_v52, %v1330_v56  ;;  %v1368_v21 = vsub.f32 1.0, %v1367_v20 }
 0x4a0   : > { %v1335_v59 = vsel %vm1334_vm4, %v2015_v52, %v1331_v57  ;;  %v1369_v22 = vmul.f32 %v2019_v18, %v1368_v21 }
 0x4a1   : > { %v1340_v61 = vsel %vm1337_vm5, %v1339_v58, %v1335_v59 }
 0x4a2   : > { %v1342_v62 = vmul.f32 1.0614054, %v1340_v61  ;;  %v1370_v23 = vadd.f32 %v2019_v18, %v1369_v22 }
 0x4a4   : > { %v1343_v63 = vadd.f32 -1.4531521, %v1342_v62  ;;  %v1372_v24 = vsel %vm1371_vm8, %v2019_v18, %v1370_v23 }
 0x4a6   : > { %v1344_v1 = vmul.f32 %v1343_v63, %v1340_v61 }
 0x4a8   : > { %v1345_v2 = vadd.f32 1.4214138, %v1344_v1 }
 0x4aa   : > { %v1346_v4 = vmul.f32 %v1345_v2, %v1340_v61 }
 0x4ac   : > { %v1347_v5 = vadd.f32 -0.28449672, %v1346_v4 }
 0x4ae   : > { %v1348_v19 = vmul.f32 %v1347_v5, %v1340_v61 }
 0x4b0   : > { %v1349_v6 = vadd.f32 0.2548296, %v1348_v19 }
 0x4b2   : > { %v1350_v7 = vmul.f32 %v1349_v6, %v1340_v61 }
 0x4b4   : > { %v1355_v9 = vmul.f32 %v2017_v8, %v1350_v7 }
 0x4b6   : > { %v1356_v10 = vsub.f32 1.0, %v1355_v9 }
 0x4b8   : > { %v1358_v11 = vsub.f32 0.0, %v1356_v10 }
 0x4ba   : > { %v1359_v12 = vsel %vm1357_vm6, %v1356_v10, %v1358_v11 }
 0x4bb   : > { %v1360_v14 = vadd.f32 1.0, %v1359_v12 }
 0x4bd   : > { %v1361_v15 = vmul.f32 %v1360_v14, %v1322_v13 }
 0x4bf   : > { %v1363_v16 = vsel %vm1362_vm7, %v1361_v15, 0.0 }
 0x4c0   : > { %1364 = vadd.xlane.f32.xlu0 %v1363_v16 }
 0x533   : > { %v1365_v25 = vpop.xlane.xlu0 %1364 }
 0x534   : > { %v1373_v27 = vmul.f32 %v1372_v24, %v1365_v25 }
 0x536   : > { %v1374_v29 = vsub.f32 %v1361_v15, %v1373_v27 }
 0x538   : > { %v1375_v30 = vmul.f32 %v1374_v29, %v1374_v29 }
 0x53a   : > { %v1376_v31 = vsel %vm1362_vm7, %v1375_v30, 0.0 }
 0x53b   : > { %1377 = vadd.xlane.f32.xlu1 %v1376_v31 }
 0x5ae   : > { %v1378_v32 = vpop.xlane.xlu1 %1377 }
 0x5af   : > { %v1379_v33 = vmul.f32 %v1378_v32, %v1372_v24 }
 0x5b1   : > { %v1380_v34 = vadd.f32 1e-05, %v1379_v33 }
 0x5b3   : > { %2020 = vrsqrt.f32 %v1380_v34  ;;  %vm1387_vm10 = vweird.f32 %v1380_v34 }
 0x5b9   : > { %v2021_v35 = vpop.eup %2020 }
 0x5ba   : > { %v1382_v36 = vmul.f32 %v2021_v35, %v1380_v34  ;;  %vm1388_vm9 = vweird.f32 %v2021_v35 }
 0x5bb   : > { %vm1389_vm11 = vmor %vm1387_vm10, %vm1388_vm9 }
 0x5bc   : > { %v1383_v37 = vmul.f32 %v2021_v35, %v1382_v36 }
 0x5be   : > { %v1384_v38 = vmul.f32 0.5, %v1383_v37 }
 0x5c0   : > { %v1385_v39 = vsub.f32 1.5, %v1384_v38 }
 0x5c2   : > { %v1386_v40 = vmul.f32 %v2021_v35, %v1385_v39 }
 0x5c4   : > { %v1390_v42 = vsel %vm1389_vm11, %v2021_v35, %v1386_v40 }
 0x5c5   : > { %v1391_v28 = vmul.f32 %v1390_v42, %v1374_v29 }
 0x5c7   : > { %v1396_v46 = vmul.f32 %v1980_v41, %v1391_v28 }
 0x5c9   : > { %v1401_v47 = vadd.f32 %v1981_v45, %v1396_v46 }
 0x5cb   : > { %1402 = vst.msk [vmem:[%s409_s16] sm:$0xff] %vm1362_vm7, %v1401_v47 }
 0x5cc   : > { %2151 = shalt.err (!%p2148_p8)
}
 0x5cd   : > { %1904 = dma.vmem_to_hbm [thread:$0]  (%p2311_p5), %s1417_s0, 128, %s1419_s18, %s1404_s19  }
 0x5ce PF: > { %p1926_p9 = scmp.ge.s32.totalorder %s2196_s24, 2  ;;  %s1430_s15 = sand.u32 1, %s2184_s21  }
 0x5cf   : > { %s1431_s3 = scalar_lea.sflag [#allocation6], %s1430_s15 }
 0x5d0   : > { %p1917_p10 = pnand %p1926_p9, %p2315_p6 }
 0x5d2   : > { %p1918_p11 = pneg %p1917_p10 }
 0x5d4   : > { %2179 = dma.done.wait (%p1918_p11), %s1431_s3, 128  }
 0x5d5   : > { %2181 = vsyncadd (%p1918_p11), %s1431_s3, 4294967168  ;;  %s2559_s24 = sld [smem:[#allocation16_spill]]  ;;  %s2562_s21 = smov %s2188_s22 }
 0x5d6   : > { %s2560_s23 = sld [smem:[#allocation15_spill]] }
 0x5d7   : > { %s2561_s26 = sld [smem:[#allocation17_spill]] }
 0x5db   : > { %p31_p12 = scmp.ge.s32.totalorder %s2559_s24, 4  }
 0x5dc   : > { %s2563_s22 = smov %s2560_s23 }
 0x5dd   : > { %s2564_s23 = smov %s2561_s26  ;;  %33 = sbr.rel (!%p31_p12) target bundleno = 12 (0xc), region = 111 }
 0x5e2   :  { %1437 = vsyncpa [#allocation5], 1 }
 0x5e3   :  { %1439 = vsyncpa [#allocation5 + $0x1], 1 }
 0x5e4   :  { %1440 = vsyncpa [#allocation8], 1 }
 0x5e5   :  { %1441 = vsyncpa [#allocation6], 1 }
 0x5e6   :  { %1443 = vsyncpa [#allocation6 + $0x1], 1 }

</bundles_post_ra>
